<compile_context>
chip_gen: v6e
topology: v6e:2x2x1
jax: 0.10.0
libtpu: 0.0.40
codegen_flags: <defaults>
</compile_context>

<pallas_src>
import jax
import jax.numpy as jnp
from jax.experimental import pallas as pl
from jax.experimental.pallas import tpu as pltpu

# ----------------------- small configuration --------------------------------
VISION_DIM = 128          # stand-in for 1152
LANG_DIM = 128            # stand-in for 896
NUM_QUERIES = 16          # 4x4 query grid (stand-in for 256)
NUM_HEADS = 4             # stand-in for 16
HEAD_DIM = VISION_DIM // NUM_HEADS
PATCH = 4                 # stand-in for 14
IMG = 16
IMG_CH = 3
BATCH = 2
SEQ_LEN = 8
VOCAB = 256
N_PATCH_SIDE = IMG // PATCH
N_PATCHES = N_PATCH_SIDE * N_PATCH_SIDE          # 16 vision tokens
TOTAL_LEN = NUM_QUERIES + 2 + SEQ_LEN            # N_adapter + 2 + seq_len = 26
EPS = 1e-5
PATCH_DIM = IMG_CH * PATCH * PATCH               # 48 (K passed unpadded)
HALF = VISION_DIM // 2
ATTN_SCALE = 1.0 / float(HEAD_DIM) ** 0.5

# ---- row layout of the packed f32 const stack (width = VISION_DIM lanes) ----
_R_POS = 0                       # rows [ 0, 16)  vision pos-embed
_R_QUERY = 16                    # rows [16, 32)  learned queries
_R_QCOS = 32                     # rows [32, 48)  query RoPE cos
_R_QSIN = 48                     # rows [48, 64)  query RoPE sin (sign folded)
_R_KCOS = 64                     # rows [64, 80)  key   RoPE cos
_R_KSIN = 80                     # rows [80, 96)  key   RoPE sin (sign folded)
_R_VEC = 96                      # rows [96,112)  (1,Dv) bias/LN vectors
CONST_ROWS = 112
(_V_PATCH_B, _V_POSTLN_G, _V_POSTLN_B, _V_LNQ_G, _V_LNQ_B,
 _V_LNKV_G, _V_LNKV_B, _V_B_IN_Q, _V_B_IN_K, _V_B_IN_V, _V_B_OUT) = range(11)

# ---- lane layout of the packed bf16 weight slab (128 rows) ------------------
_W_KV = 0                        # lanes [  0,256)  [w_k | w_v @ w_in_v]
_W_IN_Q = 256                    # lanes [256,384)  MHA in_proj_q
_W_IN_K = 384                    # lanes [384,512)  MHA in_proj_k
_W_OUT = 512                     # lanes [512,640)  out_proj @ proj_out
_W_LM = 640                      # lanes [640,896)  lm_head
W_BIG_COLS = 896


# --------------------------- in-kernel helpers --------------------------------
def _layernorm(x, g, b):
    mu = jnp.mean(x, axis=-1, keepdims=True)
    xc = x - mu
    var = jnp.mean(xc * xc, axis=-1, keepdims=True)
    return xc * jax.lax.rsqrt(var + EPS) * g + b


def _rope(x, cos, sin_signed):
    # rotate_half(x) = [-x2, x1]; roll gives [x2, x1]; sign is folded into sin.
    return x * cos + pltpu.roll(x, shift=HALF, axis=1) * sin_signed


# ------------------------- the single fused kernel ----------------------------
def _fused_kernel(x_ref, text_ref, const_ref, patchw_ref, wbig_ref,
                  o_ref, ins_ref):
    """One grid step = one batch element: patch embed -> adapter -> LM head."""
    vec = lambda i: const_ref[_R_VEC + i:_R_VEC + i + 1, :]         # (1, Dv) f32

    # ---- vision encoder stand-in: patch-embed matmul + pos-embed + LN ------
    # TODO(synk): pretrained SigLIP transformer blocks are not reproduced.
    x = x_ref[0]                                                    # (T, 48) bf16
    f = jnp.dot(x, patchw_ref[...], preferred_element_type=jnp.float32)
    f = f + vec(_V_PATCH_B) + const_ref[_R_POS:_R_POS + N_PATCHES, :]
    f = _layernorm(f, vec(_V_POSTLN_G), vec(_V_POSTLN_B))           # (T, Dv) f32
    f_bf = f.astype(jnp.bfloat16)

    # ---- query path (batch-invariant; recomputed — one (Q,Dv)x(Dv,Dv)) -----
    q = _layernorm(const_ref[_R_QUERY:_R_QUERY + NUM_QUERIES, :],
                   vec(_V_LNQ_G), vec(_V_LNQ_B))
    q = _rope(q, const_ref[_R_QCOS:_R_QCOS + NUM_QUERIES, :],
              const_ref[_R_QSIN:_R_QSIN + NUM_QUERIES, :])
    qp = jnp.dot(q.astype(jnp.bfloat16),
                 wbig_ref[:, _W_IN_Q:_W_IN_Q + VISION_DIM],
                 preferred_element_type=jnp.float32) + vec(_V_B_IN_Q)
    qp = (qp * ATTN_SCALE).astype(jnp.bfloat16)                     # pre-scaled

    # ---- keys / values: single shared-LHS matmul against [w_k | w_v_fused] --
    kv = jnp.dot(f_bf, wbig_ref[:, _W_KV:_W_KV + 2 * VISION_DIM],
                 preferred_element_type=jnp.float32)                # (T, 2*Dv)
    k = kv[:, :VISION_DIM]                                          # 128-lane split
    vp = (kv[:, VISION_DIM:] + vec(_V_B_IN_V)).astype(jnp.bfloat16)
    k = _layernorm(k, vec(_V_LNKV_G), vec(_V_LNKV_B))
    k = _rope(k, const_ref[_R_KCOS:_R_KCOS + N_PATCHES, :],
              const_ref[_R_KSIN:_R_KSIN + N_PATCHES, :])
    kp = (jnp.dot(k.astype(jnp.bfloat16),
                  wbig_ref[:, _W_IN_K:_W_IN_K + VISION_DIM],
                  preferred_element_type=jnp.float32) + vec(_V_B_IN_K)
          ).astype(jnp.bfloat16)

    # ---- multi-head attention; per-head accumulation (no lane concat) -------
    w_out = wbig_ref[:, _W_OUT:_W_OUT + LANG_DIM]                   # (Dv, Dl) bf16
    out = jnp.broadcast_to(vec(_V_B_OUT), (NUM_QUERIES, LANG_DIM))  # f32 acc
    for h in range(NUM_HEADS):                                      # static unroll
        lo = h * HEAD_DIM
        q_h = qp[:, lo:lo + HEAD_DIM]
        k_h = kp[:, lo:lo + HEAD_DIM]
        v_h = vp[:, lo:lo + HEAD_DIM]
        s = jax.lax.dot_general(q_h, k_h, (((1,), (1,)), ((), ())),
                                preferred_element_type=jnp.float32)  # (Q, T)
        m = jnp.max(s, axis=-1, keepdims=True)
        p = jnp.exp(s - m)
        p = p * pl.reciprocal(jnp.sum(p, axis=-1, keepdims=True), approx=True)
        head = jnp.dot(p.astype(jnp.bfloat16), v_h,
                       preferred_element_type=jnp.float32).astype(jnp.bfloat16)
        out = out + jnp.dot(head, w_out[lo:lo + HEAD_DIM, :],
                            preferred_element_type=jnp.float32)

    # ---- insert adapted rows into text embeds (rows 1..Q) and run LM head ---
    # TODO(synk): the pretrained Qwen2.5 causal decoder layers are not
    # reproduced; stand-in = inserted embeddings -> LM-head matmul.
    ins_ref[...] = text_ref[0]                                      # (L, Dl) f32
    ins_ref[1:NUM_QUERIES + 1, :] = out
    logits = jnp.dot(ins_ref[...].astype(jnp.bfloat16),
                     wbig_ref[:, _W_LM:_W_LM + VOCAB],
                     preferred_element_type=jnp.float32)            # (L, VOCAB)
    o_ref[0] = logits


# ----------------------------- RoPE tables ------------------------------------
def get_rope_2d_angles(dim, grid_side):
    # 2D RoPE: half the channels encode the row index, half the column index.
    # Angle layout [ang_r, ang_c, ang_r, ang_c] (quarter-dim blocks) so the
    # global rotate_half pairing (i, i + dim/2) shares the same angle.
    quarter = dim // 4
    inv_freq = 1.0 / (10000.0 ** (jnp.arange(quarter, dtype=jnp.float32) / quarter))
    pos = jnp.arange(grid_side, dtype=jnp.float32)
    row = jnp.repeat(pos, grid_side)
    col = jnp.tile(pos, grid_side)
    ang_r = row[:, None] * inv_freq[None, :]
    ang_c = col[:, None] * inv_freq[None, :]
    ang = jnp.concatenate([ang_r, ang_c, ang_r, ang_c], axis=-1)    # (T, dim)
    return jnp.cos(ang), jnp.sin(ang)


# --------------------------- parameter init -----------------------------------
def init_params(key):
    ks = jax.random.split(key, 10)

    def tn(k, shape, std=0.02):  # trunc_normal_(std=0.02) analogue
        return (std * jax.random.truncated_normal(k, -2.0, 2.0, shape)).astype(jnp.float32)

    Dv = VISION_DIM
    patch_w = tn(ks[0], (PATCH_DIM, Dv))         # (48, 128), K unpadded
    pos_embed = tn(ks[1], (N_PATCHES, Dv))
    queries = tn(ks[2], (NUM_QUERIES, Dv))
    w_k = tn(ks[3], (Dv, Dv))                    # proj_keys (no bias)
    w_v = tn(ks[4], (Dv, Dv))                    # proj_values (no bias)
    w_in = tn(ks[5], (Dv, 3 * Dv))               # MHA in_proj (stored transposed)
    w_attn_out = tn(ks[6], (Dv, Dv))             # MHA out_proj
    b_attn_out = jnp.zeros((Dv,), jnp.float32)   # PyTorch default init = 0
    w_proj_out = tn(ks[7], (Dv, LANG_DIM))       # adapter proj_out (no bias)

    # rotate_half sign (-1 first half, +1 second half) folded into sin tables.
    sign = jnp.concatenate([-jnp.ones((HALF,), jnp.float32),
                            jnp.ones((HALF,), jnp.float32)])
    qcos, qsin = get_rope_2d_angles(Dv, int(NUM_QUERIES ** 0.5))
    kcos, ksin = get_rope_2d_angles(Dv, N_PATCH_SIDE)

    # (1,Dv) bias / LayerNorm vectors, packed as rows (zeros = biases of the
    # bias-free / zero-init'd layers; LN gammas = 1).
    vec_rows = jnp.zeros((CONST_ROWS - _R_VEC, Dv), jnp.float32)
    vec_rows = vec_rows.at[_V_POSTLN_G].set(jnp.ones((Dv,), jnp.float32))
    vec_rows = vec_rows.at[_V_LNQ_G].set(jnp.ones((Dv,), jnp.float32))
    vec_rows = vec_rows.at[_V_LNKV_G].set(jnp.ones((Dv,), jnp.float32))
    vec_rows = vec_rows.at[_V_B_OUT].set(b_attn_out @ w_proj_out)   # fused out bias

    consts = jnp.concatenate([
        pos_embed, queries,
        qcos, qsin * sign[None, :],
        kcos, ksin * sign[None, :],
        vec_rows,
    ], axis=0)                                                       # (112, 128) f32

    # single bf16 weight slab: [w_k | w_v@w_in_v | in_q | in_k | out_fused | lm]
    w_big = jnp.concatenate([
        w_k,
        w_v @ w_in[:, 2 * Dv:],                  # fused values path
        w_in[:, :Dv],                            # in_proj_q
        w_in[:, Dv:2 * Dv],                      # in_proj_k
        w_attn_out @ w_proj_out,                 # fused output path
        tn(ks[9], (LANG_DIM, VOCAB)),            # lm_head (no bias)
    ], axis=1).astype(jnp.bfloat16)              # (128, 896)

    return dict(
        patch_w=patch_w.astype(jnp.bfloat16),
        consts=consts,
        w_big=w_big,
        tok_embed=tn(ks[8], (VOCAB, LANG_DIM)),
    )


# ------------------------------ forward ---------------------------------------
def tiny_qwen_vl_forward(params, pixel_values, input_ids, attention_mask):
    B = pixel_values.shape[0]
    # layout: NCHW -> (B, num_patches, C*patch*patch) patch-major rows, K=48.
    x = pixel_values.reshape(B, IMG_CH, N_PATCH_SIDE, PATCH, N_PATCH_SIDE, PATCH)
    x = x.transpose(0, 2, 4, 1, 3, 5).reshape(B, N_PATCHES, PATCH_DIM)
    x = x.astype(jnp.bfloat16)
    # token embedding gather stays in XLA; insertion happens inside the kernel.
    text_embeds = jnp.take(params["tok_embed"], input_ids, axis=0)   # (B, L, Dl) f32
    # TODO(synk): attention_mask unused — the pretrained Qwen2.5 decoder layers
    # are not reproduced in this stand-in.
    del attention_mask

    def bcast(shape):
        n = len(shape)
        return pl.BlockSpec(shape, lambda b, _n=n: (0,) * _n)        # batch-broadcast

    # NOTE: at real model dims (1152 / 896 / 256 queries) mark the broadcast
    # weight BlockSpecs pipeline_mode=pl.Buffered(1) and set an explicit
    # vmem_limit_bytes (v7x: 64 MiB physical, v5e: 16 MiB default scoped).
    logits = pl.pallas_call(
        _fused_kernel,
        out_shape=jax.ShapeDtypeStruct((B, TOTAL_LEN, VOCAB), jnp.float32),
        grid=(B,),
        in_specs=[
            pl.BlockSpec((1, N_PATCHES, PATCH_DIM), lambda b: (b, 0, 0)),
            pl.BlockSpec((1, TOTAL_LEN, LANG_DIM), lambda b: (b, 0, 0)),
            bcast((CONST_ROWS, VISION_DIM)),
            bcast((PATCH_DIM, VISION_DIM)),
            bcast((VISION_DIM, W_BIG_COLS)),
        ],
        out_specs=pl.BlockSpec((1, TOTAL_LEN, VOCAB), lambda b: (b, 0, 0)),
        scratch_shapes=[pltpu.VMEM((TOTAL_LEN, LANG_DIM), jnp.float32)],
        compiler_params=pltpu.CompilerParams(dimension_semantics=("parallel",)),
    )(x, text_embeds, params["consts"], params["patch_w"], params["w_big"])
    return logits


# ---------------------------------- main --------------------------------------
if __name__ == "__main__":
    key = jax.random.PRNGKey(0)
    pkey, xkey, ikey = jax.random.split(key, 3)
    params = init_params(pkey)

    pixel_values = jax.random.normal(xkey, (BATCH, IMG_CH, IMG, IMG), jnp.float32)
    input_ids = jax.random.randint(ikey, (BATCH, TOTAL_LEN), 0, VOCAB, dtype=jnp.int32)
    attention_mask = jnp.ones((BATCH, TOTAL_LEN), jnp.int32)

    logits = jax.jit(tiny_qwen_vl_forward)(params, pixel_values, input_ids, attention_mask)
    jax.block_until_ready(logits)
    assert logits.shape == (BATCH, TOTAL_LEN, VOCAB)
    assert bool(jnp.all(jnp.isfinite(logits)))
    print("KERNEL_OK")
</pallas_src>

<mosaic_0001>
module attributes {stable_mosaic.version = 11 : i64} {
  func.func @_fused_kernel(%arg0: i32, %arg1: memref<1x16x48xbf16, #tpu.memory_space<vmem>>, %arg2: memref<1x26x128xf32, #tpu.memory_space<vmem>>, %arg3: memref<112x128xf32, #tpu.memory_space<vmem>>, %arg4: memref<48x128xbf16, #tpu.memory_space<vmem>>, %arg5: memref<128x896xbf16, #tpu.memory_space<vmem>>, %arg6: memref<1x26x256xf32, #tpu.memory_space<vmem>>, %arg7: memref<26x128xf32, #tpu.memory_space<vmem>>) attributes {dimension_semantics = [#tpu.dimension_semantics<parallel>], iteration_bounds = array<i64: 2>, scalar_prefetch = 0 : i64, scratch_operands = 1 : i64, tpu.core_type = #tpu.core_type<tc>, window_params = [{transform_indices = @transform_0, window_bounds = array<i64: 1, 16, 48>}, {transform_indices = @transform_1, window_bounds = array<i64: 1, 26, 128>}, {pipeline_mode = #tpu.pipeline_mode<synchronous>, transform_indices = @transform_2, window_bounds = array<i64: 112, 128>}, {pipeline_mode = #tpu.pipeline_mode<synchronous>, transform_indices = @transform_3, window_bounds = array<i64: 48, 128>}, {pipeline_mode = #tpu.pipeline_mode<synchronous>, transform_indices = @transform_4, window_bounds = array<i64: 128, 896>}, {transform_indices = @transform_5, window_bounds = array<i64: 1, 26, 256>}]} {
    %c0 = arith.constant 0 : index
    %c0_0 = arith.constant 0 : index
    %c0_1 = arith.constant 0 : index
    %0 = vector.load %arg1[%c0, %c0_0, %c0_1] : memref<1x16x48xbf16, #tpu.memory_space<vmem>>, vector<1x16x48xbf16>
    %1 = vector.shape_cast %0 : vector<1x16x48xbf16> to vector<16x48xbf16>
    %c0_2 = arith.constant 0 : index
    %c0_3 = arith.constant 0 : index
    %2 = vector.load %arg4[%c0_2, %c0_3] : memref<48x128xbf16, #tpu.memory_space<vmem>>, vector<48x128xbf16>
    %cst = arith.constant dense<0.000000e+00> : vector<16x128xf32>
    %3 = tpu.matmul %1, %2, %cst {dimension_numbers = #tpu.dot_dimension_numbers<[1], [0], [0], [1], [0, 0, 1, 1], [], []>} : vector<16x48xbf16>, vector<48x128xbf16>, vector<16x128xf32> -> vector<16x128xf32>
    %c96 = arith.constant 96 : index
    %c0_4 = arith.constant 0 : index
    %4 = vector.load %arg3[%c96, %c0_4] : memref<112x128xf32, #tpu.memory_space<vmem>>, vector<1x128xf32>
    %5 = vector.broadcast %4 : vector<1x128xf32> to vector<16x128xf32>
    %6 = arith.addf %3, %5 : vector<16x128xf32>
    %c0_5 = arith.constant 0 : index
    %c0_6 = arith.constant 0 : index
    %7 = vector.load %arg3[%c0_5, %c0_6] : memref<112x128xf32, #tpu.memory_space<vmem>>, vector<16x128xf32>
    %8 = arith.addf %6, %7 : vector<16x128xf32>
    %c97 = arith.constant 97 : index
    %c0_7 = arith.constant 0 : index
    %9 = vector.load %arg3[%c97, %c0_7] : memref<112x128xf32, #tpu.memory_space<vmem>>, vector<1x128xf32>
    %c98 = arith.constant 98 : index
    %c0_8 = arith.constant 0 : index
    %10 = vector.load %arg3[%c98, %c0_8] : memref<112x128xf32, #tpu.memory_space<vmem>>, vector<1x128xf32>
    %cst_9 = arith.constant dense<0.000000e+00> : vector<16xf32>
    %11 = vector.multi_reduction <add>, %8, %cst_9 [1] : vector<16x128xf32> to vector<16xf32>
    %12 = vector.shape_cast %11 : vector<16xf32> to vector<16x1xf32>
    %cst_10 = arith.constant 1.280000e+02 : f32
    %13 = vector.broadcast %cst_10 : f32 to vector<16x1xf32>
    %14 = arith.divf %12, %13 : vector<16x1xf32>
    %15 = vector.broadcast %14 : vector<16x1xf32> to vector<16x128xf32>
    %16 = arith.subf %8, %15 : vector<16x128xf32>
    %17 = arith.mulf %16, %16 : vector<16x128xf32>
    %cst_11 = arith.constant dense<0.000000e+00> : vector<16xf32>
    %18 = vector.multi_reduction <add>, %17, %cst_11 [1] : vector<16x128xf32> to vector<16xf32>
    %19 = vector.shape_cast %18 : vector<16xf32> to vector<16x1xf32>
    %cst_12 = arith.constant 1.280000e+02 : f32
    %20 = vector.broadcast %cst_12 : f32 to vector<16x1xf32>
    %21 = arith.divf %19, %20 : vector<16x1xf32>
    %cst_13 = arith.constant 9.99999974E-6 : f32
    %22 = vector.broadcast %cst_13 : f32 to vector<16x1xf32>
    %23 = arith.addf %21, %22 : vector<16x1xf32>
    %24 = math.rsqrt %23 : vector<16x1xf32>
    %25 = vector.broadcast %24 : vector<16x1xf32> to vector<16x128xf32>
    %26 = arith.mulf %16, %25 : vector<16x128xf32>
    %27 = vector.broadcast %9 : vector<1x128xf32> to vector<16x128xf32>
    %28 = arith.mulf %26, %27 : vector<16x128xf32>
    %29 = vector.broadcast %10 : vector<1x128xf32> to vector<16x128xf32>
    %30 = arith.addf %28, %29 : vector<16x128xf32>
    %31 = arith.truncf %30 : vector<16x128xf32> to vector<16x128xbf16>
    %c16 = arith.constant 16 : index
    %c0_14 = arith.constant 0 : index
    %32 = vector.load %arg3[%c16, %c0_14] : memref<112x128xf32, #tpu.memory_space<vmem>>, vector<16x128xf32>
    %c99 = arith.constant 99 : index
    %c0_15 = arith.constant 0 : index
    %33 = vector.load %arg3[%c99, %c0_15] : memref<112x128xf32, #tpu.memory_space<vmem>>, vector<1x128xf32>
    %c100 = arith.constant 100 : index
    %c0_16 = arith.constant 0 : index
    %34 = vector.load %arg3[%c100, %c0_16] : memref<112x128xf32, #tpu.memory_space<vmem>>, vector<1x128xf32>
    %cst_17 = arith.constant dense<0.000000e+00> : vector<16xf32>
    %35 = vector.multi_reduction <add>, %32, %cst_17 [1] : vector<16x128xf32> to vector<16xf32>
    %36 = vector.shape_cast %35 : vector<16xf32> to vector<16x1xf32>
    %cst_18 = arith.constant 1.280000e+02 : f32
    %37 = vector.broadcast %cst_18 : f32 to vector<16x1xf32>
    %38 = arith.divf %36, %37 : vector<16x1xf32>
    %39 = vector.broadcast %38 : vector<16x1xf32> to vector<16x128xf32>
    %40 = arith.subf %32, %39 : vector<16x128xf32>
    %41 = arith.mulf %40, %40 : vector<16x128xf32>
    %cst_19 = arith.constant dense<0.000000e+00> : vector<16xf32>
    %42 = vector.multi_reduction <add>, %41, %cst_19 [1] : vector<16x128xf32> to vector<16xf32>
    %43 = vector.shape_cast %42 : vector<16xf32> to vector<16x1xf32>
    %cst_20 = arith.constant 1.280000e+02 : f32
    %44 = vector.broadcast %cst_20 : f32 to vector<16x1xf32>
    %45 = arith.divf %43, %44 : vector<16x1xf32>
    %cst_21 = arith.constant 9.99999974E-6 : f32
    %46 = vector.broadcast %cst_21 : f32 to vector<16x1xf32>
    %47 = arith.addf %45, %46 : vector<16x1xf32>
    %48 = math.rsqrt %47 : vector<16x1xf32>
    %49 = vector.broadcast %48 : vector<16x1xf32> to vector<16x128xf32>
    %50 = arith.mulf %40, %49 : vector<16x128xf32>
    %51 = vector.broadcast %33 : vector<1x128xf32> to vector<16x128xf32>
    %52 = arith.mulf %50, %51 : vector<16x128xf32>
    %53 = vector.broadcast %34 : vector<1x128xf32> to vector<16x128xf32>
    %54 = arith.addf %52, %53 : vector<16x128xf32>
    %c32 = arith.constant 32 : index
    %c0_22 = arith.constant 0 : index
    %55 = vector.load %arg3[%c32, %c0_22] : memref<112x128xf32, #tpu.memory_space<vmem>>, vector<16x128xf32>
    %c48 = arith.constant 48 : index
    %c0_23 = arith.constant 0 : index
    %56 = vector.load %arg3[%c48, %c0_23] : memref<112x128xf32, #tpu.memory_space<vmem>>, vector<16x128xf32>
    %57 = arith.mulf %54, %55 : vector<16x128xf32>
    %c64_i32 = arith.constant 64 : i32
    %58 = tpu.dynamic_rotate %54 by %c64_i32 dim 1 : vector<16x128xf32>, i32 -> vector<16x128xf32>
    %59 = arith.mulf %58, %56 : vector<16x128xf32>
    %60 = arith.addf %57, %59 : vector<16x128xf32>
    %61 = arith.truncf %60 : vector<16x128xf32> to vector<16x128xbf16>
    %c0_24 = arith.constant 0 : index
    %c256 = arith.constant 256 : index
    %62 = vector.load %arg5[%c0_24, %c256] : memref<128x896xbf16, #tpu.memory_space<vmem>>, vector<128x128xbf16>
    %cst_25 = arith.constant dense<0.000000e+00> : vector<16x128xf32>
    %63 = tpu.matmul %61, %62, %cst_25 {dimension_numbers = #tpu.dot_dimension_numbers<[1], [0], [0], [1], [0, 0, 1, 1], [], []>} : vector<16x128xbf16>, vector<128x128xbf16>, vector<16x128xf32> -> vector<16x128xf32>
    %c103 = arith.constant 103 : index
    %c0_26 = arith.constant 0 : index
    %64 = vector.load %arg3[%c103, %c0_26] : memref<112x128xf32, #tpu.memory_space<vmem>>, vector<1x128xf32>
    %65 = vector.broadcast %64 : vector<1x128xf32> to vector<16x128xf32>
    %66 = arith.addf %63, %65 : vector<16x128xf32>
    %cst_27 = arith.constant 0.176776692 : f32
    %67 = vector.broadcast %cst_27 : f32 to vector<16x128xf32>
    %68 = arith.mulf %66, %67 : vector<16x128xf32>
    %69 = arith.truncf %68 : vector<16x128xf32> to vector<16x128xbf16>
    %c0_28 = arith.constant 0 : index
    %c0_29 = arith.constant 0 : index
    %70 = vector.load %arg5[%c0_28, %c0_29] : memref<128x896xbf16, #tpu.memory_space<vmem>>, vector<128x256xbf16>
    %cst_30 = arith.constant dense<0.000000e+00> : vector<16x256xf32>
    %71 = tpu.matmul %31, %70, %cst_30 {dimension_numbers = #tpu.dot_dimension_numbers<[1], [0], [0], [1], [0, 0, 1, 1], [], []>} : vector<16x128xbf16>, vector<128x256xbf16>, vector<16x256xf32> -> vector<16x256xf32>
    %72 = vector.extract_strided_slice %71 {offsets = [0, 0], sizes = [16, 128], strides = [1, 1]} : vector<16x256xf32> to vector<16x128xf32>
    %73 = vector.extract_strided_slice %71 {offsets = [0, 128], sizes = [16, 128], strides = [1, 1]} : vector<16x256xf32> to vector<16x128xf32>
    %c105 = arith.constant 105 : index
    %c0_31 = arith.constant 0 : index
    %74 = vector.load %arg3[%c105, %c0_31] : memref<112x128xf32, #tpu.memory_space<vmem>>, vector<1x128xf32>
    %75 = vector.broadcast %74 : vector<1x128xf32> to vector<16x128xf32>
    %76 = arith.addf %73, %75 : vector<16x128xf32>
    %77 = arith.truncf %76 : vector<16x128xf32> to vector<16x128xbf16>
    %c101 = arith.constant 101 : index
    %c0_32 = arith.constant 0 : index
    %78 = vector.load %arg3[%c101, %c0_32] : memref<112x128xf32, #tpu.memory_space<vmem>>, vector<1x128xf32>
    %c102 = arith.constant 102 : index
    %c0_33 = arith.constant 0 : index
    %79 = vector.load %arg3[%c102, %c0_33] : memref<112x128xf32, #tpu.memory_space<vmem>>, vector<1x128xf32>
    %cst_34 = arith.constant dense<0.000000e+00> : vector<16xf32>
    %80 = vector.multi_reduction <add>, %72, %cst_34 [1] : vector<16x128xf32> to vector<16xf32>
    %81 = vector.shape_cast %80 : vector<16xf32> to vector<16x1xf32>
    %cst_35 = arith.constant 1.280000e+02 : f32
    %82 = vector.broadcast %cst_35 : f32 to vector<16x1xf32>
    %83 = arith.divf %81, %82 : vector<16x1xf32>
    %84 = vector.broadcast %83 : vector<16x1xf32> to vector<16x128xf32>
    %85 = arith.subf %72, %84 : vector<16x128xf32>
    %86 = arith.mulf %85, %85 : vector<16x128xf32>
    %cst_36 = arith.constant dense<0.000000e+00> : vector<16xf32>
    %87 = vector.multi_reduction <add>, %86, %cst_36 [1] : vector<16x128xf32> to vector<16xf32>
    %88 = vector.shape_cast %87 : vector<16xf32> to vector<16x1xf32>
    %cst_37 = arith.constant 1.280000e+02 : f32
    %89 = vector.broadcast %cst_37 : f32 to vector<16x1xf32>
    %90 = arith.divf %88, %89 : vector<16x1xf32>
    %cst_38 = arith.constant 9.99999974E-6 : f32
    %91 = vector.broadcast %cst_38 : f32 to vector<16x1xf32>
    %92 = arith.addf %90, %91 : vector<16x1xf32>
    %93 = math.rsqrt %92 : vector<16x1xf32>
    %94 = vector.broadcast %93 : vector<16x1xf32> to vector<16x128xf32>
    %95 = arith.mulf %85, %94 : vector<16x128xf32>
    %96 = vector.broadcast %78 : vector<1x128xf32> to vector<16x128xf32>
    %97 = arith.mulf %95, %96 : vector<16x128xf32>
    %98 = vector.broadcast %79 : vector<1x128xf32> to vector<16x128xf32>
    %99 = arith.addf %97, %98 : vector<16x128xf32>
    %c64 = arith.constant 64 : index
    %c0_39 = arith.constant 0 : index
    %100 = vector.load %arg3[%c64, %c0_39] : memref<112x128xf32, #tpu.memory_space<vmem>>, vector<16x128xf32>
    %c80 = arith.constant 80 : index
    %c0_40 = arith.constant 0 : index
    %101 = vector.load %arg3[%c80, %c0_40] : memref<112x128xf32, #tpu.memory_space<vmem>>, vector<16x128xf32>
    %102 = arith.mulf %99, %100 : vector<16x128xf32>
    %c64_i32_41 = arith.constant 64 : i32
    %103 = tpu.dynamic_rotate %99 by %c64_i32_41 dim 1 : vector<16x128xf32>, i32 -> vector<16x128xf32>
    %104 = arith.mulf %103, %101 : vector<16x128xf32>
    %105 = arith.addf %102, %104 : vector<16x128xf32>
    %106 = arith.truncf %105 : vector<16x128xf32> to vector<16x128xbf16>
    %c0_42 = arith.constant 0 : index
    %c384 = arith.constant 384 : index
    %107 = vector.load %arg5[%c0_42, %c384] : memref<128x896xbf16, #tpu.memory_space<vmem>>, vector<128x128xbf16>
    %cst_43 = arith.constant dense<0.000000e+00> : vector<16x128xf32>
    %108 = tpu.matmul %106, %107, %cst_43 {dimension_numbers = #tpu.dot_dimension_numbers<[1], [0], [0], [1], [0, 0, 1, 1], [], []>} : vector<16x128xbf16>, vector<128x128xbf16>, vector<16x128xf32> -> vector<16x128xf32>
    %c104 = arith.constant 104 : index
    %c0_44 = arith.constant 0 : index
    %109 = vector.load %arg3[%c104, %c0_44] : memref<112x128xf32, #tpu.memory_space<vmem>>, vector<1x128xf32>
    %110 = vector.broadcast %109 : vector<1x128xf32> to vector<16x128xf32>
    %111 = arith.addf %108, %110 : vector<16x128xf32>
    %112 = arith.truncf %111 : vector<16x128xf32> to vector<16x128xbf16>
    %c0_45 = arith.constant 0 : index
    %c512 = arith.constant 512 : index
    %113 = vector.load %arg5[%c0_45, %c512] : memref<128x896xbf16, #tpu.memory_space<vmem>>, vector<128x128xbf16>
    %c106 = arith.constant 106 : index
    %c0_46 = arith.constant 0 : index
    %114 = vector.load %arg3[%c106, %c0_46] : memref<112x128xf32, #tpu.memory_space<vmem>>, vector<1x128xf32>
    %115 = vector.shape_cast %114 : vector<1x128xf32> to vector<1x128xf32>
    %116 = vector.broadcast %115 : vector<1x128xf32> to vector<16x128xf32>
    %117 = vector.extract_strided_slice %69 {offsets = [0, 0], sizes = [16, 32], strides = [1, 1]} : vector<16x128xbf16> to vector<16x32xbf16>
    %118 = vector.extract_strided_slice %112 {offsets = [0, 0], sizes = [16, 32], strides = [1, 1]} : vector<16x128xbf16> to vector<16x32xbf16>
    %119 = vector.extract_strided_slice %77 {offsets = [0, 0], sizes = [16, 32], strides = [1, 1]} : vector<16x128xbf16> to vector<16x32xbf16>
    %cst_47 = arith.constant dense<0.000000e+00> : vector<16x16xf32>
    %120 = tpu.matmul %117, %118, %cst_47 {dimension_numbers = #tpu.dot_dimension_numbers<[1], [1], [0], [0], [0, 0, 1, 0], [], []>} : vector<16x32xbf16>, vector<16x32xbf16>, vector<16x16xf32> -> vector<16x16xf32>
    %cst_48 = arith.constant dense<0xFF800000> : vector<16xf32>
    %121 = vector.multi_reduction <maximumf>, %120, %cst_48 [1] : vector<16x16xf32> to vector<16xf32>
    %122 = vector.shape_cast %121 : vector<16xf32> to vector<16x1xf32>
    %123 = vector.broadcast %122 : vector<16x1xf32> to vector<16x16xf32>
    %124 = arith.subf %120, %123 : vector<16x16xf32>
    %125 = math.exp %124 : vector<16x16xf32>
    %cst_49 = arith.constant dense<0.000000e+00> : vector<16xf32>
    %126 = vector.multi_reduction <add>, %125, %cst_49 [1] : vector<16x16xf32> to vector<16xf32>
    %127 = vector.shape_cast %126 : vector<16xf32> to vector<16x1xf32>
    %128 = tpu.reciprocal %127 {approx = true} : vector<16x1xf32> -> vector<16x1xf32>
    %129 = vector.broadcast %128 : vector<16x1xf32> to vector<16x16xf32>
    %130 = arith.mulf %125, %129 : vector<16x16xf32>
    %131 = arith.truncf %130 : vector<16x16xf32> to vector<16x16xbf16>
    %cst_50 = arith.constant dense<0.000000e+00> : vector<16x32xf32>
    %132 = tpu.matmul %131, %119, %cst_50 {dimension_numbers = #tpu.dot_dimension_numbers<[1], [0], [0], [1], [0, 0, 1, 1], [], []>} : vector<16x16xbf16>, vector<16x32xbf16>, vector<16x32xf32> -> vector<16x32xf32>
    %133 = arith.truncf %132 : vector<16x32xf32> to vector<16x32xbf16>
    %134 = vector.extract_strided_slice %113 {offsets = [0, 0], sizes = [32, 128], strides = [1, 1]} : vector<128x128xbf16> to vector<32x128xbf16>
    %cst_51 = arith.constant dense<0.000000e+00> : vector<16x128xf32>
    %135 = tpu.matmul %133, %134, %cst_51 {dimension_numbers = #tpu.dot_dimension_numbers<[1], [0], [0], [1], [0, 0, 1, 1], [], []>} : vector<16x32xbf16>, vector<32x128xbf16>, vector<16x128xf32> -> vector<16x128xf32>
    %136 = arith.addf %116, %135 : vector<16x128xf32>
    %137 = vector.extract_strided_slice %69 {offsets = [0, 32], sizes = [16, 32], strides = [1, 1]} : vector<16x128xbf16> to vector<16x32xbf16>
    %138 = vector.extract_strided_slice %112 {offsets = [0, 32], sizes = [16, 32], strides = [1, 1]} : vector<16x128xbf16> to vector<16x32xbf16>
    %139 = vector.extract_strided_slice %77 {offsets = [0, 32], sizes = [16, 32], strides = [1, 1]} : vector<16x128xbf16> to vector<16x32xbf16>
    %cst_52 = arith.constant dense<0.000000e+00> : vector<16x16xf32>
    %140 = tpu.matmul %137, %138, %cst_52 {dimension_numbers = #tpu.dot_dimension_numbers<[1], [1], [0], [0], [0, 0, 1, 0], [], []>} : vector<16x32xbf16>, vector<16x32xbf16>, vector<16x16xf32> -> vector<16x16xf32>
    %cst_53 = arith.constant dense<0xFF800000> : vector<16xf32>
    %141 = vector.multi_reduction <maximumf>, %140, %cst_53 [1] : vector<16x16xf32> to vector<16xf32>
    %142 = vector.shape_cast %141 : vector<16xf32> to vector<16x1xf32>
    %143 = vector.broadcast %142 : vector<16x1xf32> to vector<16x16xf32>
    %144 = arith.subf %140, %143 : vector<16x16xf32>
    %145 = math.exp %144 : vector<16x16xf32>
    %cst_54 = arith.constant dense<0.000000e+00> : vector<16xf32>
    %146 = vector.multi_reduction <add>, %145, %cst_54 [1] : vector<16x16xf32> to vector<16xf32>
    %147 = vector.shape_cast %146 : vector<16xf32> to vector<16x1xf32>
    %148 = tpu.reciprocal %147 {approx = true} : vector<16x1xf32> -> vector<16x1xf32>
    %149 = vector.broadcast %148 : vector<16x1xf32> to vector<16x16xf32>
    %150 = arith.mulf %145, %149 : vector<16x16xf32>
    %151 = arith.truncf %150 : vector<16x16xf32> to vector<16x16xbf16>
    %cst_55 = arith.constant dense<0.000000e+00> : vector<16x32xf32>
    %152 = tpu.matmul %151, %139, %cst_55 {dimension_numbers = #tpu.dot_dimension_numbers<[1], [0], [0], [1], [0, 0, 1, 1], [], []>} : vector<16x16xbf16>, vector<16x32xbf16>, vector<16x32xf32> -> vector<16x32xf32>
    %153 = arith.truncf %152 : vector<16x32xf32> to vector<16x32xbf16>
    %154 = vector.extract_strided_slice %113 {offsets = [32, 0], sizes = [32, 128], strides = [1, 1]} : vector<128x128xbf16> to vector<32x128xbf16>
    %cst_56 = arith.constant dense<0.000000e+00> : vector<16x128xf32>
    %155 = tpu.matmul %153, %154, %cst_56 {dimension_numbers = #tpu.dot_dimension_numbers<[1], [0], [0], [1], [0, 0, 1, 1], [], []>} : vector<16x32xbf16>, vector<32x128xbf16>, vector<16x128xf32> -> vector<16x128xf32>
    %156 = arith.addf %136, %155 : vector<16x128xf32>
    %157 = vector.extract_strided_slice %69 {offsets = [0, 64], sizes = [16, 32], strides = [1, 1]} : vector<16x128xbf16> to vector<16x32xbf16>
    %158 = vector.extract_strided_slice %112 {offsets = [0, 64], sizes = [16, 32], strides = [1, 1]} : vector<16x128xbf16> to vector<16x32xbf16>
    %159 = vector.extract_strided_slice %77 {offsets = [0, 64], sizes = [16, 32], strides = [1, 1]} : vector<16x128xbf16> to vector<16x32xbf16>
    %cst_57 = arith.constant dense<0.000000e+00> : vector<16x16xf32>
    %160 = tpu.matmul %157, %158, %cst_57 {dimension_numbers = #tpu.dot_dimension_numbers<[1], [1], [0], [0], [0, 0, 1, 0], [], []>} : vector<16x32xbf16>, vector<16x32xbf16>, vector<16x16xf32> -> vector<16x16xf32>
    %cst_58 = arith.constant dense<0xFF800000> : vector<16xf32>
    %161 = vector.multi_reduction <maximumf>, %160, %cst_58 [1] : vector<16x16xf32> to vector<16xf32>
    %162 = vector.shape_cast %161 : vector<16xf32> to vector<16x1xf32>
    %163 = vector.broadcast %162 : vector<16x1xf32> to vector<16x16xf32>
    %164 = arith.subf %160, %163 : vector<16x16xf32>
    %165 = math.exp %164 : vector<16x16xf32>
    %cst_59 = arith.constant dense<0.000000e+00> : vector<16xf32>
    %166 = vector.multi_reduction <add>, %165, %cst_59 [1] : vector<16x16xf32> to vector<16xf32>
    %167 = vector.shape_cast %166 : vector<16xf32> to vector<16x1xf32>
    %168 = tpu.reciprocal %167 {approx = true} : vector<16x1xf32> -> vector<16x1xf32>
    %169 = vector.broadcast %168 : vector<16x1xf32> to vector<16x16xf32>
    %170 = arith.mulf %165, %169 : vector<16x16xf32>
    %171 = arith.truncf %170 : vector<16x16xf32> to vector<16x16xbf16>
    %cst_60 = arith.constant dense<0.000000e+00> : vector<16x32xf32>
    %172 = tpu.matmul %171, %159, %cst_60 {dimension_numbers = #tpu.dot_dimension_numbers<[1], [0], [0], [1], [0, 0, 1, 1], [], []>} : vector<16x16xbf16>, vector<16x32xbf16>, vector<16x32xf32> -> vector<16x32xf32>
    %173 = arith.truncf %172 : vector<16x32xf32> to vector<16x32xbf16>
    %174 = vector.extract_strided_slice %113 {offsets = [64, 0], sizes = [32, 128], strides = [1, 1]} : vector<128x128xbf16> to vector<32x128xbf16>
    %cst_61 = arith.constant dense<0.000000e+00> : vector<16x128xf32>
    %175 = tpu.matmul %173, %174, %cst_61 {dimension_numbers = #tpu.dot_dimension_numbers<[1], [0], [0], [1], [0, 0, 1, 1], [], []>} : vector<16x32xbf16>, vector<32x128xbf16>, vector<16x128xf32> -> vector<16x128xf32>
    %176 = arith.addf %156, %175 : vector<16x128xf32>
    %177 = vector.extract_strided_slice %69 {offsets = [0, 96], sizes = [16, 32], strides = [1, 1]} : vector<16x128xbf16> to vector<16x32xbf16>
    %178 = vector.extract_strided_slice %112 {offsets = [0, 96], sizes = [16, 32], strides = [1, 1]} : vector<16x128xbf16> to vector<16x32xbf16>
    %179 = vector.extract_strided_slice %77 {offsets = [0, 96], sizes = [16, 32], strides = [1, 1]} : vector<16x128xbf16> to vector<16x32xbf16>
    %cst_62 = arith.constant dense<0.000000e+00> : vector<16x16xf32>
    %180 = tpu.matmul %177, %178, %cst_62 {dimension_numbers = #tpu.dot_dimension_numbers<[1], [1], [0], [0], [0, 0, 1, 0], [], []>} : vector<16x32xbf16>, vector<16x32xbf16>, vector<16x16xf32> -> vector<16x16xf32>
    %cst_63 = arith.constant dense<0xFF800000> : vector<16xf32>
    %181 = vector.multi_reduction <maximumf>, %180, %cst_63 [1] : vector<16x16xf32> to vector<16xf32>
    %182 = vector.shape_cast %181 : vector<16xf32> to vector<16x1xf32>
    %183 = vector.broadcast %182 : vector<16x1xf32> to vector<16x16xf32>
    %184 = arith.subf %180, %183 : vector<16x16xf32>
    %185 = math.exp %184 : vector<16x16xf32>
    %cst_64 = arith.constant dense<0.000000e+00> : vector<16xf32>
    %186 = vector.multi_reduction <add>, %185, %cst_64 [1] : vector<16x16xf32> to vector<16xf32>
    %187 = vector.shape_cast %186 : vector<16xf32> to vector<16x1xf32>
    %188 = tpu.reciprocal %187 {approx = true} : vector<16x1xf32> -> vector<16x1xf32>
    %189 = vector.broadcast %188 : vector<16x1xf32> to vector<16x16xf32>
    %190 = arith.mulf %185, %189 : vector<16x16xf32>
    %191 = arith.truncf %190 : vector<16x16xf32> to vector<16x16xbf16>
    %cst_65 = arith.constant dense<0.000000e+00> : vector<16x32xf32>
    %192 = tpu.matmul %191, %179, %cst_65 {dimension_numbers = #tpu.dot_dimension_numbers<[1], [0], [0], [1], [0, 0, 1, 1], [], []>} : vector<16x16xbf16>, vector<16x32xbf16>, vector<16x32xf32> -> vector<16x32xf32>
    %193 = arith.truncf %192 : vector<16x32xf32> to vector<16x32xbf16>
    %194 = vector.extract_strided_slice %113 {offsets = [96, 0], sizes = [32, 128], strides = [1, 1]} : vector<128x128xbf16> to vector<32x128xbf16>
    %cst_66 = arith.constant dense<0.000000e+00> : vector<16x128xf32>
    %195 = tpu.matmul %193, %194, %cst_66 {dimension_numbers = #tpu.dot_dimension_numbers<[1], [0], [0], [1], [0, 0, 1, 1], [], []>} : vector<16x32xbf16>, vector<32x128xbf16>, vector<16x128xf32> -> vector<16x128xf32>
    %196 = arith.addf %176, %195 : vector<16x128xf32>
    %c0_67 = arith.constant 0 : index
    %c0_68 = arith.constant 0 : index
    %c0_69 = arith.constant 0 : index
    %197 = vector.load %arg2[%c0_67, %c0_68, %c0_69] : memref<1x26x128xf32, #tpu.memory_space<vmem>>, vector<1x26x128xf32>
    %198 = vector.shape_cast %197 : vector<1x26x128xf32> to vector<26x128xf32>
    %c0_70 = arith.constant 0 : index
    %c0_71 = arith.constant 0 : index
    %199 = vector.load %arg7[%c0_70, %c0_71] : memref<26x128xf32, #tpu.memory_space<vmem>>, vector<26x128xf32>
    tpu.vector_store %arg7[%c0_70, %c0_71], %198 {strides = array<i32>} : memref<26x128xf32, #tpu.memory_space<vmem>>, vector<26x128xf32>,
    %c1 = arith.constant 1 : index
    %c0_72 = arith.constant 0 : index
    %200 = vector.load %arg7[%c1, %c0_72] : memref<26x128xf32, #tpu.memory_space<vmem>>, vector<16x128xf32>
    tpu.vector_store %arg7[%c1, %c0_72], %196 {strides = array<i32>} : memref<26x128xf32, #tpu.memory_space<vmem>>, vector<16x128xf32>,
    %c0_73 = arith.constant 0 : index
    %c0_74 = arith.constant 0 : index
    %201 = vector.load %arg7[%c0_73, %c0_74] : memref<26x128xf32, #tpu.memory_space<vmem>>, vector<26x128xf32>
    %202 = arith.truncf %201 : vector<26x128xf32> to vector<26x128xbf16>
    %c0_75 = arith.constant 0 : index
    %c640 = arith.constant 640 : index
    %203 = vector.load %arg5[%c0_75, %c640] : memref<128x896xbf16, #tpu.memory_space<vmem>>, vector<128x256xbf16>
    %cst_76 = arith.constant dense<0.000000e+00> : vector<26x256xf32>
    %204 = tpu.matmul %202, %203, %cst_76 {dimension_numbers = #tpu.dot_dimension_numbers<[1], [0], [0], [1], [0, 0, 1, 1], [], []>} : vector<26x128xbf16>, vector<128x256xbf16>, vector<26x256xf32> -> vector<26x256xf32>
    %c0_77 = arith.constant 0 : index
    %c0_78 = arith.constant 0 : index
    %c0_79 = arith.constant 0 : index
    %205 = vector.load %arg6[%c0_77, %c0_78, %c0_79] : memref<1x26x256xf32, #tpu.memory_space<vmem>>, vector<1x26x256xf32>
    %206 = vector.shape_cast %205 : vector<1x26x256xf32> to vector<26x256xf32>
    %207 = vector.shape_cast %204 : vector<26x256xf32> to vector<1x26x256xf32>
    tpu.vector_store %arg6[%c0_77, %c0_78, %c0_79], %207 {strides = array<i32>} : memref<1x26x256xf32, #tpu.memory_space<vmem>>, vector<1x26x256xf32>,
    return
  }
  func.func @transform_0(%arg0: i32) -> (i32, i32, i32) {
    %c0_i32 = arith.constant 0 : i32
    %c0_i32_0 = arith.constant 0 : i32
    %c0_i32_1 = arith.constant 0 : i32
    return %arg0, %c0_i32, %c0_i32_0 : i32, i32, i32
  }
  func.func @transform_1(%arg0: i32) -> (i32, i32, i32) {
    %c0_i32 = arith.constant 0 : i32
    %c0_i32_0 = arith.constant 0 : i32
    %c0_i32_1 = arith.constant 0 : i32
    return %arg0, %c0_i32, %c0_i32_0 : i32, i32, i32
  }
  func.func @transform_2(%arg0: i32) -> (i32, i32) {
    %c0_i32 = arith.constant 0 : i32
    %c0_i32_0 = arith.constant 0 : i32
    %c0_i32_1 = arith.constant 0 : i32
    return %c0_i32, %c0_i32_0 : i32, i32
  }
  func.func @transform_3(%arg0: i32) -> (i32, i32) {
    %c0_i32 = arith.constant 0 : i32
    %c0_i32_0 = arith.constant 0 : i32
    %c0_i32_1 = arith.constant 0 : i32
    return %c0_i32, %c0_i32_0 : i32, i32
  }
  func.func @transform_4(%arg0: i32) -> (i32, i32) {
    %c0_i32 = arith.constant 0 : i32
    %c0_i32_0 = arith.constant 0 : i32
    %c0_i32_1 = arith.constant 0 : i32
    return %c0_i32, %c0_i32_0 : i32, i32
  }
  func.func @transform_5(%arg0: i32) -> (i32, i32, i32) {
    %c0_i32 = arith.constant 0 : i32
    %c0_i32_0 = arith.constant 0 : i32
    %c0_i32_1 = arith.constant 0 : i32
    return %arg0, %c0_i32, %c0_i32_0 : i32, i32, i32
  }
}

</mosaic_0001>

<bundles_post_ra>
// kernel: tiny_qwen_vl_forward.1
= control target key start
LH: loop header
LB: loop body
LE: loop exit
PB: predicated region body
PF: predicated region fallthrough
CT: control target
= control target key end

     0   :  { %s2281_s18 = smov 0   ;;  %s2699_s0 = inlined_call_operand.vmem [shape: bf16[2,16,48], index: 0, kind: input, shape index: {}]   ;;  %s2700_s1 = inlined_call_operand.vmem [shape: f32[2,26,128], index: 1, kind: input, shape index: {}]   ;;  %s2701_s2 = inlined_call_operand.vmem [shape: f32[112,128], index: 2, kind: input, shape index: {}]   ;;  %s2702_s3 = inlined_call_operand.vmem [shape: bf16[48,128], index: 3, kind: input, shape index: {}]   ;;  %s2703_s4 = inlined_call_operand.vmem [shape: bf16[128,896], index: 4, kind: input, shape index: {}]   ;;  %s2704_s5 = inlined_call_operand.vmem [shape: f32[2,26,256], index: 5, kind: output, shape index: {}]  }
   0x1 LB: > { %s1823_s19 = sadd.s32 4294967295, %s2243_s18   ;;  %p1827_p0 = scmp.ge.s32.totalorder %s2243_s18, 1  ;;  %s2243_s18 = sphi %s2281_s18, %s15_s18  }
   0x2   : > { %p197_p1 = scmp.lt.s32.totalorder %s2243_s18, 3 }
   0x4   : > { %p198_p2 = pnand %p1827_p0, %p197_p1 }
   0x5   : > { %p230_p3 = scmp.lt.s32.totalorder (!%p198_p2), %s1823_s19, 1  ;;  %s2249_s23 = smov (!%p198_p2), 96  }
   0x6   : > { %201 = sbr.rel (%p198_p2) target bundleno = 3738 (0xe9a), region = 40  ;;  %s2250_s10 = smov (!%p198_p2), 32  }
   0xb   : > { %v2117_v0 = vld [vmem:[%s2702_s3 + $0x10] sm:$0xff]   ;;  %v2245_v1 = vmov 0.0   ;;  %v2118_v2 = vld [vmem:[%s2702_s3 + $0x8] sm:$0xff]   ;;  %vm2246_vm0 = vmmov 0   ;;  %v2119_v3 = vld [vmem:[%s2702_s3] sm:$0xff]   ;;  %s2706_s19 = smov (!%p230_p3, %s1823_s19), 1 }
   0xc   : > { %1973 = vmatprep.subr.bf16.mxu1 %v2245_v1  ;;  %1979 = vmatprep.mubr.msk.bf16.mxu1 %vm2246_vm0, %v2245_v1  ;;  %s1920_s26 = sshll.u32 %s2706_s19, 3  ;;  %vm282_vm1 = vcmask 392192   ;;  %v1834_v5 = vld [vmem:[%s2701_s2 + $0x60] ss:$0 sm:$0xff]  ;;  %v328_v12 = vld [vmem:[%s2701_s2 + $0x8] sm:$0xff]  ;;  %v2247_v35 = vmov 0  }
   0xd   : > { %1974 = vmatpush3.bf16.msra.mxu1 %v2117_v0  ;;  %s234_s29 = scalar_lea.vmem %s2699_s0, %s1920_s26  ;;  %v327_v7 = vld [vmem:[%s2701_s2] sm:$0xff]  ;;  %v2121_v16 = vld [vmem:[%s2703_s4 + $0x18c] ss:$28 sps:$4 sm:$0xff]   ;;  %v2124_v26 = vld [vmem:[%s2703_s4 + $0x154] ss:$28 sps:$4 sm:$0xff]   ;;  %663 = vmatprep.mubr.bf16.mxu0 %v2247_v35  ;;  %vm865_vm2 = vcmask 261120  }
   0xe   : > { %1975 = vmatprep.subr.bf16.mxu1 %v2245_v1  ;;  %v2120_v4 = vld [vmem:[%s234_s29] sm:$0xff]   ;;  %631 = vmatprep.subr.bf16.mxu0 %v2121_v16  ;;  %v2126_v27 = vld [vmem:[%s2703_s4 + $0x150] ss:$28 sps:$4 sm:$0xff]   ;;  %v2127_v28 = vld [vmem:[%s2703_s4 + $0x11c] ss:$28 sps:$4 sm:$0xff]   ;;  %s2248_s29 = smov 64  }
   0xf   : > { %v2123_v17 = vld [vmem:[%s2703_s4 + $0x188] ss:$28 sps:$4 sm:$0xff]   ;;  %v2129_v29 = vld [vmem:[%s2703_s4 + $0x118] ss:$28 sps:$4 sm:$0xff]   ;;  %v2132_v31 = vld [vmem:[%s2703_s4 + $0xe0] ss:$28 sps:$4 sm:$0xff]  }
  0x10   : > { %632 = vmatpush1.bf16.msra.mxu0 %v2123_v17  ;;  %v2130_v30 = vld [vmem:[%s2703_s4 + $0xe4] ss:$28 sps:$4 sm:$0xff]   ;;  %v2133_v32 = vld [vmem:[%s2703_s4 + $0xac] ss:$28 sps:$4 sm:$0xff]   ;;  %v2136_v34 = vld [vmem:[%s2703_s4 + $0x74] ss:$28 sps:$4 sm:$0xff]  }
  0x11   : > { %1976 = vmatpush3.bf16.msra.mxu1 %v2118_v2  ;;  %633 = vmatprep.subr.bf16.mxu0 %v2124_v26  ;;  %v2135_v33 = vld [vmem:[%s2703_s4 + $0xa8] ss:$28 sps:$4 sm:$0xff]   ;;  %v2138_v36 = vld [vmem:[%s2703_s4 + $0x70] ss:$28 sps:$4 sm:$0xff]   ;;  %v2139_v37 = vld [vmem:[%s2703_s4 + $0x3c] ss:$28 sps:$4 sm:$0xff]  }
  0x12   : > { %1977 = vmatprep.subr.bf16.mxu1 %v2245_v1  ;;  %v2141_v38 = vld [vmem:[%s2703_s4 + $0x38] ss:$28 sps:$4 sm:$0xff]   ;;  %v2142_v39 = vld [vmem:[%s2703_s4 + $0x4] ss:$28 sps:$4 sm:$0xff]   ;;  %v2149_v17 = vld [vmem:[%s2703_s4 + $0xb0] ss:$28 sps:$4 sm:$0xff]  }
  0x13   : > { %v2144_v40 = vld [vmem:[%s2703_s4] ss:$28 sps:$4 sm:$0xff]   ;;  %v369_v41 = vld [vmem:[%s2701_s2 + $0x10] sm:$0xff]  ;;  %v2148_v16 = vld [vmem:[%s2703_s4 + $0xe8] ss:$28 sps:$4 sm:$0xff]   ;;  %vm913_vm3 = vcmask 130048  }
  0x14   : > { %634 = vmatpush1.bf16.msra.mxu0 %v2126_v27  ;;  %v370_v42 = vld [vmem:[%s2701_s2 + $0x18] sm:$0xff]  ;;  %v1840_v51 = vld [vmem:[%s2701_s2 + $0x61] ss:$0 sm:$0xff]  ;;  %v1841_v55 = vld [vmem:[%s2701_s2 + $0x62] ss:$0 sm:$0xff]  ;;  %s1921_s13 = sshll.u32 %s2706_s19, 5 }
  0x15   : > { %1978 = vmatpush3.bf16.msra.mxu1 %v2119_v3  ;;  %635 = vmatprep.subr.bf16.mxu0 %v2127_v28  ;;  %s239_s16 = scalar_lea.vmem %s2700_s1, %s1921_s13 }
  0x16   : > { %1983 = vmatprep.subr.bf16.mxu1 %v2245_v1 }
  0x18   : > { %1980 = vmatmul.mubr.msk.bf16.vlgmr.msra.gmra.mxu1 %vm282_vm1, %v2120_v4  ;;  %636 = vmatpush1.bf16.msra.mxu0 %v2129_v29 }
  0x19   : > { %1999 = vmatprep.mubr.msk.bf16.mxu1 %vm2246_vm0, %v2245_v1  ;;  %637 = vmatprep.subr.bf16.mxu0 %v2130_v30 }
  0x1c   : > { %638 = vmatpush1.bf16.msra.mxu0 %v2132_v31 }
  0x1d   : > { %639 = vmatprep.subr.bf16.mxu0 %v2133_v32  ;;  %v2150_v32 = vld [vmem:[%s2703_s4 + $0x78] ss:$28 sps:$4 sm:$0xff]  }
  0x20   : > { %640 = vmatpush1.bf16.msra.mxu0 %v2135_v33 }
  0x21   : > { %641 = vmatprep.subr.bf16.mxu0 %v2136_v34  ;;  %v1842_v34 = vld [vmem:[%s2701_s2 + $0x63] ss:$0 sm:$0xff] }
  0x24   : > { %642 = vmatpush1.bf16.msra.mxu0 %v2138_v36  ;;  %v2151_v36 = vld [vmem:[%s2703_s4 + $0x40] ss:$28 sps:$4 sm:$0xff]  }
  0x25   : > { %643 = vmatprep.subr.bf16.mxu0 %v2139_v37 }
  0x28   : > { %644 = vmatpush1.bf16.msra.mxu0 %v2141_v38  ;;  %v1843_v38 = vld [vmem:[%s2701_s2 + $0x64] ss:$0 sm:$0xff] }
  0x29   : > { %645 = vmatprep.subr.bf16.mxu0 %v2142_v39 }
  0x2c   : > { %646 = vmatpush1.bf16.msra.mxu0 %v2144_v40 }
  0x2d   : > { %2029 = vmatprep.subr.bf16.mxu0 %v2245_v1 }
  0xd8   : > { %v320_v6 = vpop.f32.mrf.mxu1 }
  0xd9   : > { %v321_v8 = vadd.f32 %v1834_v5, %v320_v6  ;;  %v1869_v6 = vld [vmem:[%s2701_s2 + $0x69] ss:$0 sm:$0xff] }
  0xda   : > { %v1981_v9 = vpop.f32.mrf.mxu1 }
  0xdb   : > { %v329_v10 = vadd.f32 %v327_v7, %v321_v8 }
  0xdc   : > { %v323_v11 = vpop.f32.mrf.mxu1 }
  0xdd   : > { %v324_v13 = vadd.f32 %v1834_v5, %v323_v11  ;;  %333 = vadd.xlane.f32.xlu0 %v329_v10 }
  0xde   : > { %v1982_v14 = vpop.f32.mrf.mxu1 }
  0xdf   : > { %v330_v15 = vadd.f32 %v328_v12, %v324_v13  ;;  %v2145_v13 = vld [vmem:[%s2703_s4 + $0x190] ss:$28 sps:$4 sm:$0xff]   ;;  %v2146_v14 = vld [vmem:[%s2703_s4 + $0x158] ss:$28 sps:$4 sm:$0xff]  }
  0xe0   : > { %1984 = vmatpush3.bf16.msra.mxu1 %v2145_v13 }
  0xe1   : > { %335 = vadd.xlane.f32.xlu0 %v330_v15  ;;  %1985 = vmatprep.subr.bf16.mxu1 %v2245_v1 }
  0xe4   : > { %1986 = vmatpush3.bf16.msra.mxu1 %v2146_v14  ;;  %v2156_v14 = vld [vmem:[%s2703_s4 + $0xec] ss:$28 sps:$4 sm:$0xff]  }
  0xe5   : > { %373 = vadd.xlane.f32.xlu0 %v369_v41  ;;  %1987 = vmatprep.subr.bf16.mxu1 %v2245_v1 }
 0x166   : > { %v334_v18 = vpop.xlane.xlu0 %333 }
 0x167   : > { %v338_v19 = vmul.f32 0.0078125, %v334_v18 }
 0x169   : > { %v340_v20 = vsub.f32 %v329_v10, %v338_v19 }
 0x16a   : > { %v336_v21 = vpop.xlane.xlu0 %335 }
 0x16b   : > { %v339_v22 = vmul.f32 0.0078125, %v336_v21  ;;  %v342_v23 = vmul.f32 %v340_v20, %v340_v20 }
 0x16d   : > { %v341_v24 = vsub.f32 %v330_v15, %v339_v22  ;;  %344 = vadd.xlane.f32.xlu1 %v342_v23  ;;  %v2147_v15 = vld [vmem:[%s2703_s4 + $0x120] ss:$28 sps:$4 sm:$0xff]  }
 0x16e   : > { %v374_v60 = vpop.xlane.xlu0 %373  ;;  %1988 = vmatpush3.bf16.msra.mxu1 %v2147_v15 }
 0x16f   : > { %v343_v25 = vmul.f32 %v341_v24, %v341_v24  ;;  %v377_v61 = vmul.f32 0.0078125, %v374_v60  ;;  %1989 = vmatprep.subr.bf16.mxu1 %v2245_v1 }
 0x171   : > { %346 = vadd.xlane.f32.xlu1 %v343_v25  ;;  %v379_v63 = vsub.f32 %v369_v41, %v377_v61  ;;  %v2152_v41 = vld [vmem:[%s2703_s4 + $0x8] ss:$28 sps:$4 sm:$0xff]  }
 0x172   : > { %1990 = vmatpush3.bf16.msra.mxu1 %v2148_v16 }
 0x173   : > { %v381_v4 = vmul.f32 %v379_v63, %v379_v63  ;;  %1991 = vmatprep.subr.bf16.mxu1 %v2245_v1 }
 0x175   : > { %375 = vadd.xlane.f32.xlu1 %v370_v42 }
 0x176   : > { %1992 = vmatpush3.bf16.msra.mxu1 %v2149_v17  ;;  %v2157_v17 = vld [vmem:[%s2703_s4 + $0xb4] ss:$28 sps:$4 sm:$0xff]  }
 0x177   : > { %1993 = vmatprep.subr.bf16.mxu1 %v2245_v1 }
 0x17a   : > { %1994 = vmatpush3.bf16.msra.mxu1 %v2150_v32 }
 0x17b   : > { %1995 = vmatprep.subr.bf16.mxu1 %v2245_v1 }
 0x17e   : > { %1996 = vmatpush3.bf16.msra.mxu1 %v2151_v36 }
 0x17f   : > { %1997 = vmatprep.subr.bf16.mxu1 %v2245_v1 }
 0x182   : > { %1998 = vmatpush3.bf16.msra.mxu1 %v2152_v41 }
 0x183   : > { %2003 = vmatprep.subr.bf16.mxu1 %v2245_v1 }
 0x1f6   : > { %v345_v43 = vpop.xlane.xlu1 %344 }
 0x1f7   : > { %v348_v44 = vmul.f32 0.0078125, %v345_v43 }
 0x1f9   : > { %v350_v45 = vadd.f32 1e-05, %v348_v44 }
 0x1fa   : > { %v347_v46 = vpop.xlane.xlu1 %346 }
 0x1fb   : > { %2193 = vrsqrt.f32 %v350_v45  ;;  %v349_v47 = vmul.f32 0.0078125, %v347_v46 }
 0x1fd   : > { %v351_v48 = vadd.f32 1e-05, %v349_v47 }
 0x1fe   : > { %v376_v62 = vpop.xlane.xlu1 %375 }
 0x1ff   : > { %2195 = vrsqrt.f32 %v351_v48  ;;  %v378_v0 = vmul.f32 0.0078125, %v376_v62 }
 0x201   : > { %v380_v3 = vsub.f32 %v370_v42, %v378_v0  ;;  %v2153_v0 = vld [vmem:[%s2703_s4 + $0x194] ss:$28 sps:$4 sm:$0xff]  }
 0x203   : > { %v382_v8 = vmul.f32 %v380_v3, %v380_v3 }
 0x208   : > { %v2194_v49 = vpop.eup %2193 }
 0x209   : > { %v354_v50 = vmul.f32 %v2194_v49, %v340_v20 }
 0x20b   : > { %v360_v54 = vmul.f32 %v1840_v51, %v354_v50  ;;  %v409_v50 = vld [vmem:[%s2701_s2 + $0x30] sm:$0xff] }
 0x20c   : > { %v2196_v52 = vpop.eup %2195 }
 0x20d   : > { %v355_v53 = vmul.f32 %v2196_v52, %v341_v24  ;;  %v366_v57 = vadd.f32 %v1841_v55, %v360_v54  ;;  %v408_v54 = vld [vmem:[%s2701_s2 + $0x28] sm:$0xff] }
 0x20f   : > { %v361_v56 = vmul.f32 %v1840_v51, %v355_v53  ;;  %v407_v53 = vld [vmem:[%s2701_s2 + $0x20] sm:$0xff] }
 0x211   : > { %v367_v58 = vadd.f32 %v1841_v55, %v361_v56  ;;  %v410_v55 = vld [vmem:[%s2701_s2 + $0x38] sm:$0xff] }
 0x213   : > { %v368_v59 = vpack.c.bf16 %v367_v58, %v366_v57 }
 0x215   : > { %664 = vmatmul.mubr.bf16.vlgmr.msra.gmra.mxu0 %v368_v59 }
 0x216   : > { %2031 = vmatprep.mubr.msk.bf16.mxu0 %vm2246_vm0, %v2245_v1 }
 0x2d5   : > { %v665_v2 = vpop.f32.mrf.mxu0 }
 0x2d6   : > { %684 = vadd.xlane.f32.xlu0 %v665_v2 }
 0x2d7   : > { %v667_v5 = vpop.f32.mrf.mxu0 }
 0x2d8   : > { %v679_v10 = vadd.f32 %v1869_v6, %v667_v5  ;;  %v1870_v5 = vld [vmem:[%s2701_s2 + $0x65] ss:$0 sm:$0xff] }
 0x2d9   : > { %v669_v7 = vpop.f32.mrf.mxu0 }
 0x2da   : > { %686 = vadd.xlane.f32.xlu1 %v669_v7  ;;  %383 = vadd.xlane.f32.xlu0 %v381_v4 }
 0x2db   : > { %v671_v9 = vpop.f32.mrf.mxu0 }
 0x2dc   : > { %v680_v11 = vadd.f32 %v1869_v6, %v671_v9 }
 0x2de   : > { %v2388_v12 = vpack.c.bf16 %v680_v11, %v679_v10  ;;  %385 = vadd.xlane.f32.xlu1 %v382_v8  ;;  %v2155_v8 = vld [vmem:[%s2703_s4 + $0x124] ss:$28 sps:$4 sm:$0xff]  }
 0x2e0   : > { %2030 = vmatpush3.bf16.msra.mxu0 %v2388_v12 }
 0x2e1   : > { %2035 = vmatprep.subr.bf16.mxu0 %v2245_v1 }
 0x35f   : > { %v685_v18 = vpop.xlane.xlu0 %684 }
 0x360   : > { %v688_v19 = vmul.f32 0.0078125, %v685_v18  ;;  %v2158_v18 = vld [vmem:[%s2703_s4 + $0x7c] ss:$28 sps:$4 sm:$0xff]  }
 0x362   : > { %v2412_v20 = vsub.f32 %v665_v2, %v688_v19  ;;  %v2159_v19 = vld [vmem:[%s2703_s4 + $0x44] ss:$28 sps:$4 sm:$0xff]  }
 0x363   : > { %v687_v21 = vpop.xlane.xlu1 %686  ;;  %v384_v22 = vpop.xlane.xlu0 %383 }
 0x364   : > { %v689_v23 = vmul.f32 0.0078125, %v687_v21  ;;  %v387_v24 = vmul.f32 0.0078125, %v384_v22  ;;  %v692_v25 = vmul.f32 %v2412_v20, %v2412_v20  ;;  %v720_v21 = vld [vmem:[%s2701_s2 + $0x50] sm:$0xff] }
 0x366   : > { %v2416_v26 = vsub.f32 %v669_v7, %v689_v23  ;;  %v389_v27 = vadd.f32 1e-05, %v387_v24  ;;  %694 = vadd.xlane.f32.xlu0 %v692_v25  ;;  %v1871_v7 = vld [vmem:[%s2701_s2 + $0x66] ss:$0 sm:$0xff]  ;;  %v719_v24 = vld [vmem:[%s2701_s2 + $0x48] sm:$0xff]  ;;  %v721_v25 = vld [vmem:[%s2701_s2 + $0x58] sm:$0xff] }
 0x367   : > { %v386_v28 = vpop.xlane.xlu1 %385  ;;  %v718_v23 = vld [vmem:[%s2701_s2 + $0x40] sm:$0xff] }
 0x368   : > { %2197 = vrsqrt.f32 %v389_v27  ;;  %v388_v29 = vmul.f32 0.0078125, %v386_v28  ;;  %v693_v30 = vmul.f32 %v2416_v26, %v2416_v26 }
 0x36a   : > { %v390_v31 = vadd.f32 1e-05, %v388_v29  ;;  %696 = vadd.xlane.f32.xlu1 %v693_v30 }
 0x36c   : > { %2199 = vrsqrt.f32 %v390_v31 }
 0x375   : > { %v2198_v33 = vpop.eup %2197 }
 0x376   : > { %v393_v37 = vmul.f32 %v2198_v33, %v379_v63 }
 0x378   : > { %v399_v39 = vmul.f32 %v1842_v34, %v393_v37 }
 0x379   : > { %v2200_v40 = vpop.eup %2199 }
 0x37a   : > { %v405_v42 = vadd.f32 %v1843_v38, %v399_v39  ;;  %v394_v43 = vmul.f32 %v2200_v40, %v380_v3  ;;  %v2154_v3 = vld [vmem:[%s2703_s4 + $0x15c] ss:$28 sps:$4 sm:$0xff]  }
 0x37c   : > { %413 = vrot.lane.b32.xlu0 %v405_v42, %s2248_s29  ;;  %v400_v44 = vmul.f32 %v1842_v34, %v394_v43  ;;  %v411_v59 = vmul.f32 %v407_v53, %v405_v42  ;;  %v1844_v34 = vld [vmem:[%s2701_s2 + $0x67] ss:$0 sm:$0xff] }
 0x37e   : > { %v406_v45 = vadd.f32 %v1843_v38, %v400_v44 }
 0x380   : > { %415 = vrot.lane.b32.xlu1 %v406_v45, %s2248_s29  ;;  %v412_v60 = vmul.f32 %v408_v54, %v406_v45 }
 0x3ef   : > { %v695_v46 = vpop.xlane.xlu0 %694 }
 0x3f0   : > { %v698_v47 = vmul.f32 0.0078125, %v695_v46  ;;  %v1872_v46 = vld [vmem:[%s2701_s2 + $0x68] ss:$0 sm:$0xff] }
 0x3f2   : > { %v700_v48 = vadd.f32 1e-05, %v698_v47 }
 0x3f3   : > { %v697_v49 = vpop.xlane.xlu1 %696  ;;  %v414_v51 = vpop.permute.xlu0 %413 }
 0x3f4   : > { %2201 = vrsqrt.f32 %v700_v48  ;;  %v699_v52 = vmul.f32 0.0078125, %v697_v49  ;;  %v417_v57 = vmul.f32 %v414_v51, %v409_v50 }
 0x3f6   : > { %v701_v56 = vadd.f32 1e-05, %v699_v52  ;;  %v419_v62 = vadd.f32 %v417_v57, %v411_v59 }
 0x3f7   : > { %v416_v58 = vpop.permute.xlu1 %415 }
 0x3f8   : > { %2203 = vrsqrt.f32 %v701_v56  ;;  %v418_v61 = vmul.f32 %v416_v58, %v410_v55 }
 0x3fa   : > { %v420_v63 = vadd.f32 %v418_v61, %v412_v60 }
 0x3fc   : > { %v421_v2 = vpack.c.bf16 %v420_v63, %v419_v62 }
 0x3fe   : > { %2000 = vmatmul.mubr.bf16.vlgmr.msra.gmra.mxu1 %v421_v2 }
 0x3ff   : > { %2004 = vmatpush3.bf16.msra.mxu1 %v2153_v0  ;;  %2019 = vmatprep.mubr.msk.bf16.mxu1 %vm2246_vm0, %v2245_v1 }
 0x400   : > { %2005 = vmatprep.subr.bf16.mxu1 %v2245_v1 }
 0x401   : > { %v2202_v4 = vpop.eup %2201 }
 0x402   : > { %v704_v6 = vmul.f32 %v2202_v4, %v2412_v20  ;;  %v2160_v20 = vld [vmem:[%s2703_s4 + $0xc] ss:$28 sps:$4 sm:$0xff]  }
 0x403   : > { %2006 = vmatpush3.bf16.msra.mxu1 %v2154_v3 }
 0x404   : > { %v710_v9 = vmul.f32 %v1870_v5, %v704_v6  ;;  %2007 = vmatprep.subr.bf16.mxu1 %v2245_v1 }
 0x405   : > { %v2204_v10 = vpop.eup %2203 }
 0x406   : > { %v716_v11 = vadd.f32 %v1871_v7, %v710_v9  ;;  %v705_v13 = vmul.f32 %v2204_v10, %v2416_v26 }
 0x407   : > { %2008 = vmatpush3.bf16.msra.mxu1 %v2155_v8 }
 0x408   : > { %724 = vrot.lane.b32.xlu1 %v716_v11, %s2248_s29  ;;  %v711_v15 = vmul.f32 %v1870_v5, %v705_v13  ;;  %2009 = vmatprep.subr.bf16.mxu1 %v2245_v1  ;;  %v722_v28 = vmul.f32 %v718_v23, %v716_v11 }
 0x40a   : > { %v717_v16 = vadd.f32 %v1871_v7, %v711_v15 }
 0x40b   : > { %2010 = vmatpush3.bf16.msra.mxu1 %v2156_v14 }
 0x40c   : > { %726 = vrot.lane.b32.xlu1 %v717_v16, %s2248_s29  ;;  %2011 = vmatprep.subr.bf16.mxu1 %v2245_v1  ;;  %v723_v29 = vmul.f32 %v719_v24, %v717_v16 }
 0x40f   : > { %2012 = vmatpush3.bf16.msra.mxu1 %v2157_v17 }
 0x410   : > { %2013 = vmatprep.subr.bf16.mxu1 %v2245_v1 }
 0x413   : > { %2014 = vmatpush3.bf16.msra.mxu1 %v2158_v18 }
 0x414   : > { %2015 = vmatprep.subr.bf16.mxu1 %v2245_v1 }
 0x417   : > { %2016 = vmatpush3.bf16.msra.mxu1 %v2159_v19 }
 0x418   : > { %2017 = vmatprep.subr.bf16.mxu1 %v2245_v1 }
 0x41b   : > { %2018 = vmatpush3.bf16.msra.mxu1 %v2160_v20 }
 0x41c   : > { %2023 = vmatprep.subr.bf16.mxu1 %v2245_v1 }
 0x47a   : > { %v725_v22 = vpop.permute.xlu1 %724 }
 0x47b   : > { %v728_v26 = vmul.f32 %v725_v22, %v720_v21 }
 0x47d   : > { %v730_v31 = vadd.f32 %v728_v26, %v722_v28 }
 0x47e   : > { %v727_v27 = vpop.permute.xlu1 %726 }
 0x47f   : > { %v729_v30 = vmul.f32 %v727_v27, %v721_v25 }
 0x481   : > { %v731_v32 = vadd.f32 %v729_v30, %v723_v29 }
 0x483   : > { %v732_v33 = vpack.c.bf16 %v731_v32, %v730_v31 }
 0x485   : > { %2020 = vmatmul.mubr.bf16.vlgmr.msra.gmra.mxu1 %v732_v33 }
 0x486   : > { %2025 = vmatprep.mubr.msk.bf16.mxu1 %vm2246_vm0, %v2245_v1 }
 0x4be   : > { %v525_v36 = vpop.f32.mrf.mxu1 }
 0x4bf   : > { %v526_v38 = vadd.f32 %v1844_v34, %v525_v36  ;;  %v2162_v36 = vld [vmem:[%s2703_s4 + $0x10] ss:$28 sps:$4 sm:$0xff]  }
 0x4c0   : > { %v2001_v37 = vpop.f32.mrf.mxu1 }
 0x4c1   : > { %v532_v42 = vmul.f32 0.17677669, %v526_v38 }
 0x4c2   : > { %v528_v39 = vpop.f32.mrf.mxu1 }
 0x4c3   : > { %v529_v40 = vadd.f32 %v1844_v34, %v528_v39  ;;  %v2161_v34 = vld [vmem:[%s2703_s4 + $0x48] ss:$28 sps:$4 sm:$0xff]  }
 0x4c4   : > { %v2002_v41 = vpop.f32.mrf.mxu1 }
 0x4c5   : > { %v533_v43 = vmul.f32 0.17677669, %v529_v40 }
 0x4c7   : > { %v2513_v44 = vpack.c.bf16 %v533_v43, %v532_v42 }
 0x4c9   : > { %1041 = vrot.lane.b32.xlu1 %v2513_v44, %s2249_s23 }
 0x53b   : > { %v1042_v56 = vpop.permute.xlu1 %1041 }
 0x545   : > { %v836_v45 = vpop.f32.mrf.mxu1 }
 0x546   : > { %v837_v49 = vadd.f32 %v1872_v46, %v836_v45 }
 0x547   : > { %v2021_v47 = vpop.f32.mrf.mxu1 }
 0x549   : > { %v839_v48 = vpop.f32.mrf.mxu1 }
 0x54a   : > { %v840_v50 = vadd.f32 %v1872_v46, %v839_v48 }
 0x54b   : > { %v2022_v51 = vpop.f32.mrf.mxu1 }
 0x54c   : > { %v2520_v52 = vpack.c.bf16 %v840_v50, %v837_v49 }
 0x54e   : > { %1044 = vrot.lane.b32.xlu0 %v2520_v52, %s2249_s23  ;;  %v870_v53 = vsel %vm865_vm2, %v2520_v52, 0 }
 0x54f   : > { %2024 = vmatpush3.bf16.xpose.msra.mxu1 %v870_v53 }
 0x550   : > { %2043 = vmatprep.subr.bf16.mxu1 %v2245_v1 }
 0x556   : > { %2026 = vmatmul.mubr.msk.bf16.vlgmr.msra.gmra.mxu1 %vm865_vm2, %v2513_v44 }
 0x557   : > { %2045 = vmatprep.mubr.msk.bf16.mxu1 %vm2246_vm0, %v2245_v1 }
 0x5c0   : > { %v1045_v54 = vpop.permute.xlu0 %1044 }
 0x5c1   : > { %v1050_v55 = vsel %vm865_vm2, %v1045_v54, 0 }
 0x5c2   : > { %2044 = vmatpush3.bf16.xpose.msra.mxu1 %v1050_v55  ;;  %v2163_v55 = vld [vmem:[%s2703_s4 + $0xb8] ss:$28 sps:$4 sm:$0xff]  }
 0x5c3   : > { %2055 = vmatprep.subr.bf16.mxu1 %v2245_v1 }
 0x5c9   : > { %2046 = vmatmul.mubr.msk.bf16.vlgmr.msra.gmra.mxu1 %vm865_vm2, %v1042_v56  ;;  %v2164_v56 = vld [vmem:[%s2703_s4 + $0x80] ss:$28 sps:$4 sm:$0xff]  }
 0x5ca   : > { %2059 = vmatprep.mubr.msk.bf16.mxu1 %vm2246_vm0, %v2245_v1  ;;  %2056 = vmatpush3.bf16.msra.mxu1 %v2163_v55 }
 0x5cb   : > { %2057 = vmatprep.subr.bf16.mxu1 %v2245_v1 }
 0x5ce   : > { %2058 = vmatpush3.bf16.msra.mxu1 %v2164_v56 }
 0x5cf   : > { %2069 = vmatprep.subr.bf16.mxu1 %v2245_v1 }
 0x616   : > { %v906_v57 = vpop.f32.mrf.mxu1 }
 0x617   : > { %v914_v58 = vsel %vm913_vm3, %v906_v57, -inf }
 0x618   : > { %915 = vmax.xlane.f32.xlu0 %v914_v58  ;;  %v2027_v59 = vpop.f32.mrf.mxu1 }
 0x61a   : > { %v909_v60 = vpop.f32.mrf.mxu1 }
 0x61b   : > { %v917_v61 = vsel %vm913_vm3, %v909_v60, -inf }
 0x61c   : > { %918 = vmax.xlane.f32.xlu1 %v917_v61  ;;  %v2028_v62 = vpop.f32.mrf.mxu1 }
 0x689   : > { %v1086_v63 = vpop.f32.mrf.mxu1 }
 0x68a   : > { %v1093_v16 = vsel %vm913_vm3, %v1086_v63, -inf }
 0x68b   : > { %v2047_v0 = vpop.f32.mrf.mxu1 }
 0x68d   : > { %v1089_v2 = vpop.f32.mrf.mxu1 }
 0x68e   : > { %v1096_v3 = vsel %vm913_vm3, %v1089_v2, -inf }
 0x68f   : > { %1097 = vmax.xlane.f32.xlu1 %v1096_v3  ;;  %v2048_v4 = vpop.f32.mrf.mxu1 }
 0x6a1   : > { %v916_v5 = vpop.xlane.xlu0 %915 }
 0x6a2   : > { %v920_v6 = vsub.f32 %v906_v57, %v916_v5 }
 0x6a4   : > { %v922_v7 = vmul.f32 1.442695, %v920_v6 }
 0x6a5   : > { %v919_v8 = vpop.xlane.xlu1 %918 }
 0x6a6   : > { %2205 = vpow2.f32 %v922_v7  ;;  %v921_v9 = vsub.f32 %v909_v60, %v919_v8 }
 0x6a8   : > { %v924_v10 = vmul.f32 1.442695, %v921_v9 }
 0x6aa   : > { %2207 = vpow2.f32 %v924_v10 }
 0x6b3   : > { %v2206_v11 = vpop.eup %2205 }
 0x6b4   : > { %v926_v13 = vsel %vm913_vm3, %v2206_v11, 0.0 }
 0x6b5   : > { %927 = vadd.xlane.f32.xlu0 %v926_v13 }
 0x6b7   : > { %v2208_v14 = vpop.eup %2207 }
 0x6b8   : > { %v929_v15 = vsel %vm913_vm3, %v2208_v14, 0.0 }
 0x6b9   : > { %930 = vadd.xlane.f32.xlu0 %v929_v15 }
 0x6bd   : > { %1094 = vmax.xlane.f32.xlu0 %v1093_v16 }
 0x718   : > { %v1098_v17 = vpop.xlane.xlu1 %1097 }
 0x719   : > { %v1100_v18 = vsub.f32 %v1089_v2, %v1098_v17 }
 0x71b   : > { %v1103_v19 = vmul.f32 1.442695, %v1100_v18 }
 0x71d   : > { %2209 = vpow2.f32 %v1103_v19 }
 0x72a   : > { %v2210_v20 = vpop.eup %2209 }
 0x72b   : > { %v1108_v21 = vsel %vm913_vm3, %v2210_v20, 0.0 }
 0x72c   : > { %1109 = vadd.xlane.f32.xlu1 %v1108_v21 }
 0x73d   : > { %1225 = vrot.lane.b32.xlu1 %v2520_v52, %s2248_s29 }
 0x73e   : > { %v928_v22 = vpop.xlane.xlu0 %927 }
 0x73f   : > { %2211 = vrcp.f32 %v928_v22 }
 0x741   : > { %1223 = vrot.lane.b32.xlu1 %v2513_v44, %s2248_s29 }
 0x742   : > { %v931_v23 = vpop.xlane.xlu0 %930 }
 0x743   : > { %2213 = vrcp.f32 %v931_v23 }
 0x746   : > { %v1095_v24 = vpop.xlane.xlu0 %1094 }
 0x747   : > { %v1099_v25 = vsub.f32 %v1086_v63, %v1095_v24 }
 0x749   : > { %v1101_v26 = vmul.f32 1.442695, %v1099_v25 }
 0x74b   : > { %2215 = vpow2.f32 %v1101_v26 }
 0x74c   : > { %v2212_v27 = vpop.eup %2211 }
 0x74d   : > { %v934_v29 = vmul.f32 %v2212_v27, %v2206_v11 }
 0x750   : > { %v2214_v28 = vpop.eup %2213 }
 0x751   : > { %v935_v30 = vmul.f32 %v2214_v28, %v2208_v14 }
 0x753   : > { %v936_v31 = vpack.c.bf16 %v935_v30, %v934_v29 }
 0x755   : > { %2032 = vmatmul.mubr.msk.bf16.vlgmr.msra.gmra.mxu0 %vm913_vm3, %v936_v31 }
 0x756   : > { %2039 = vmatprep.mubr.msk.bf16.mxu0 %vm2246_vm0, %v2245_v1  ;;  %2036 = vmatpush3.bf16.msra.mxu0 %v2161_v34 }
 0x757   : > { %2037 = vmatprep.subr.bf16.mxu0 %v2245_v1 }
 0x758   : > { %v2216_v32 = vpop.eup %2215 }
 0x759   : > { %v1105_v33 = vsel %vm913_vm3, %v2216_v32, 0.0 }
 0x75a   : > { %1106 = vadd.xlane.f32.xlu0 %v1105_v33  ;;  %2038 = vmatpush3.bf16.msra.mxu0 %v2162_v36 }
 0x75b   : > { %2049 = vmatprep.subr.bf16.mxu0 %v2245_v1 }
 0x770   : > { %1117 = vrot.lane.b32.xlu0 %v2388_v12, %s2249_s23 }
 0x7b5   : > { %v1110_v38 = vpop.xlane.xlu1 %1109 }
 0x7b9   : > { %v1226_v50 = vpop.permute.xlu1 %1225 }
 0x7ba   : > { %v1231_v53 = vsel %vm865_vm2, %v1226_v50, 0 }
 0x7bd   : > { %v1224_v54 = vpop.permute.xlu1 %1223 }
 0x7e3   : > { %v1107_v37 = vpop.xlane.xlu0 %1106 }
 0x7e4   : > { %2217 = vrcp.f32 %v1107_v37 }
 0x7e5   : > { %2219 = vrcp.f32 %v1110_v38 }
 0x7e7   : > { %v1118_v46 = vpop.permute.xlu0 %1117 }
 0x7f1   : > { %v2218_v43 = vpop.eup %2217 }
 0x7f2   : > { %v2220_v47 = vpop.eup %2219  ;;  %v1113_v48 = vmul.f32 %v2218_v43, %v2216_v32 }
 0x7f3   : > { %v1114_v49 = vmul.f32 %v2220_v47, %v2210_v20 }
 0x7f5   : > { %v1115_v51 = vpack.c.bf16 %v1114_v49, %v1113_v48 }
 0x815   : > { %v974_v39 = vpop.f32.mrf.mxu0 }
 0x817   : > { %v2033_v40 = vpop.f32.mrf.mxu0 }
 0x818   : > { %v2166_v40 = vld [vmem:[%s2703_s4 + $0xf0] ss:$28 sps:$4 sm:$0xff]  }
 0x819   : > { %v977_v41 = vpop.f32.mrf.mxu0 }
 0x81a   : > { %v981_v42 = vpack.c.bf16 %v977_v41, %v974_v39  ;;  %v2165_v39 = vld [vmem:[%s2703_s4 + $0x128] ss:$28 sps:$4 sm:$0xff]  }
 0x81b   : > { %v2034_v45 = vpop.f32.mrf.mxu0 }
 0x81c   : > { %2040 = vmatmul.mubr.msk.bf16.vlgmr.msra.gmra.mxu0 %vm865_vm2, %v981_v42 }
 0x81d   : > { %2050 = vmatpush3.bf16.msra.mxu0 %v1118_v46  ;;  %2051 = vmatprep.mubr.msk.bf16.mxu0 %vm2246_vm0, %v2245_v1 }
 0x81e   : > { %2063 = vmatprep.subr.bf16.mxu0 %v2245_v1 }
 0x824   : > { %2052 = vmatmul.mubr.msk.bf16.vlgmr.msra.gmra.mxu0 %vm913_vm3, %v1115_v51 }
 0x825   : > { %2064 = vmatpush3.bf16.xpose.msra.mxu0 %v1231_v53  ;;  %2065 = vmatprep.mubr.msk.bf16.mxu0 %vm2246_vm0, %v2245_v1 }
 0x826   : > { %2075 = vmatprep.subr.bf16.mxu0 %v2245_v1 }
 0x82c   : > { %2066 = vmatmul.mubr.msk.bf16.vlgmr.msra.gmra.mxu0 %vm865_vm2, %v1224_v54 }
 0x82d   : > { %2079 = vmatprep.mubr.msk.bf16.mxu0 %vm2246_vm0, %v2245_v1  ;;  %2076 = vmatpush3.bf16.msra.mxu0 %v2165_v39  ;;  %v2190_v39 = vld [vmem:[%s2703_s4 + $0x14] ss:$28 sps:$4 sm:$0xff]  }
 0x82e   : > { %2077 = vmatprep.subr.bf16.mxu0 %v2245_v1 }
 0x831   : > { %2078 = vmatpush3.bf16.msra.mxu0 %v2166_v40 }
 0x832   : > { %2089 = vmatprep.subr.bf16.mxu0 %v2245_v1 }
 0x8dc   : > { %v1031_v57 = vpop.f32.mrf.mxu0 }
 0x8de   : > { %v2041_v58 = vpop.f32.mrf.mxu0 }
 0x8e0   : > { %v1034_v59 = vpop.f32.mrf.mxu0 }
 0x8e2   : > { %v2042_v60 = vpop.f32.mrf.mxu0 }
 0x8e4   : > { %v1157_v61 = vpop.f32.mrf.mxu0 }
 0x8e6   : > { %v2053_v62 = vpop.f32.mrf.mxu0 }
 0x8e8   : > { %v1160_v63 = vpop.f32.mrf.mxu0 }
 0x8e9   : > { %v1164_v0 = vpack.c.bf16 %v1160_v63, %v1157_v61 }
 0x8ea   : > { %v2054_v2 = vpop.f32.mrf.mxu0 }
 0x8eb   : > { %2060 = vmatmul.mubr.msk.bf16.vlgmr.msra.gmra.mxu1 %vm865_vm2, %v1164_v0 }
 0x8ec   : > { %v1267_v3 = vpop.f32.mrf.mxu0  ;;  %2071 = vmatprep.mubr.msk.bf16.mxu1 %vm2246_vm0, %v2245_v1 }
 0x8ed   : > { %v1274_v4 = vsel %vm913_vm3, %v1267_v3, -inf }
 0x8ee   : > { %1275 = vmax.xlane.f32.xlu1 %v1274_v4  ;;  %v2067_v5 = vpop.f32.mrf.mxu0 }
 0x8f0   : > { %v1270_v6 = vpop.f32.mrf.mxu0 }
 0x8f1   : > { %v1277_v7 = vsel %vm913_vm3, %v1270_v6, -inf }
 0x8f2   : > { %1278 = vmax.xlane.f32.xlu0 %v1277_v7  ;;  %v2068_v8 = vpop.f32.mrf.mxu0 }
 0x8ff   : > { %1297 = vrot.lane.b32.xlu1 %v2388_v12, %s2248_s29  ;;  %s1922_s29 = sshll.u32 %s2706_s19, 6 }
 0x900   : > { %s244_s13 = scalar_lea.vmem %s2704_s5, %s1922_s29 }
 0x903   : > { %1403 = vrot.lane.b32.xlu1 %v2513_v44, %s2250_s10  ;;  %v1881_v44 = vld [vmem:[%s2701_s2 + $0x6a] ss:$0 sm:$0xff] }
 0x904   : > { %v1038_v21 = vadd.f32 %v1881_v44, %v1031_v57  ;;  %v1039_v25 = vadd.f32 %v1881_v44, %v1034_v59  ;;  %v2175_v44 = vld [vmem:[%s2703_s4 + $0x12c] ss:$28 sps:$4 sm:$0xff]  }
 0x977   : > { %v1276_v9 = vpop.xlane.xlu1 %1275 }
 0x978   : > { %v1280_v10 = vsub.f32 %v1267_v3, %v1276_v9 }
 0x97a   : > { %v1282_v11 = vmul.f32 1.442695, %v1280_v10 }
 0x97b   : > { %v1298_v13 = vpop.permute.xlu1 %1297  ;;  %v1279_v14 = vpop.xlane.xlu0 %1278 }
 0x97c   : > { %2221 = vpow2.f32 %v1282_v11  ;;  %v1281_v15 = vsub.f32 %v1270_v6, %v1279_v14  ;;  %2070 = vmatpush3.bf16.msra.mxu1 %v1298_v13 }
 0x97d   : > { %2083 = vmatprep.subr.bf16.mxu1 %v2245_v1 }
 0x97e   : > { %v1284_v16 = vmul.f32 1.442695, %v1281_v15 }
 0x97f   : > { %v1404_v38 = vpop.permute.xlu1 %1403 }
 0x980   : > { %2223 = vpow2.f32 %v1284_v16  ;;  %v2168_v16 = vld [vmem:[%s2703_s4 + $0x160] ss:$28 sps:$4 sm:$0xff]  }
 0x989   : > { %v2222_v17 = vpop.eup %2221 }
 0x98a   : > { %v1286_v18 = vsel %vm913_vm3, %v2222_v17, 0.0 }
 0x98b   : > { %1287 = vadd.xlane.f32.xlu0 %v1286_v18  ;;  %v2171_v18 = vld [vmem:[%s2703_s4 + $0x1a0] ss:$28 sps:$4 sm:$0xff]  }
 0x98d   : > { %v2224_v19 = vpop.eup %2223 }
 0x98e   : > { %v1289_v20 = vsel %vm913_vm3, %v2224_v19, 0.0 }
 0x98f   : > { %1290 = vadd.xlane.f32.xlu0 %v1289_v20  ;;  %v2177_v20 = vld [vmem:[%s2703_s4 + $0x130] ss:$28 sps:$4 sm:$0xff]  }
 0x9a5   : > { %1405 = vrot.lane.b32.xlu0 %v2520_v52, %s2250_s10 }
 0x9ab   : > { %v1214_v22 = vpop.f32.mrf.mxu1 }
 0x9ac   : > { %v1221_v23 = vadd.f32 %v1214_v22, %v1038_v21  ;;  %v2180_v21 = vld [vmem:[%s2703_s4 + $0xf8] ss:$28 sps:$4 sm:$0xff]  }
 0x9ad   : > { %v2061_v24 = vpop.f32.mrf.mxu1  ;;  %v2178_v22 = vld [vmem:[%s2703_s4 + $0xf4] ss:$28 sps:$4 sm:$0xff]  }
 0x9af   : > { %v1217_v26 = vpop.f32.mrf.mxu1 }
 0x9b0   : > { %v1222_v27 = vadd.f32 %v1217_v26, %v1039_v25 }
 0x9b1   : > { %v2062_v28 = vpop.f32.mrf.mxu1 }
 0x9b2   : > { %v2183_v28 = vld [vmem:[%s2703_s4 + $0xc0] ss:$28 sps:$4 sm:$0xff]  }
 0xa14   : > { %v1288_v29 = vpop.xlane.xlu0 %1287 }
 0xa15   : > { %2225 = vrcp.f32 %v1288_v29  ;;  %v1583_v29 = vld [vmem:[%s239_s16] sm:$0xff] }
 0xa16   : > { %1587 = vst [vmem:[#allocation2] sm:$0xff] %v1583_v29 }
 0xa18   : > { %v1291_v30 = vpop.xlane.xlu0 %1290 }
 0xa19   : > { %2227 = vrcp.f32 %v1291_v30  ;;  %v1584_v30 = vld [vmem:[%s239_s16 + $0x8] sm:$0xff] }
 0xa1a   : > { %1588 = vst [vmem:[#allocation2 + $0x8] sm:$0xff] %v1584_v30 }
 0xa1c   : > { %v1406_v34 = vpop.permute.xlu0 %1405 }
 0xa1d   : > { %v1411_v37 = vsel %vm865_vm2, %v1406_v34, 0  ;;  %v2184_v34 = vld [vmem:[%s2703_s4 + $0x84] ss:$28 sps:$4 sm:$0xff]  }
 0xa22   : > { %v2226_v31 = vpop.eup %2225 }
 0xa23   : > { %v1294_v33 = vmul.f32 %v2226_v31, %v2222_v17  ;;  %v2169_v17 = vld [vmem:[%s2703_s4 + $0x19c] ss:$28 sps:$4 sm:$0xff]  }
 0xa24   : > { %v1586_v31 = vld [vmem:[%s239_s16 + $0x18] sm:$0x3] }
 0xa25   : > { %1590 = vst [vmem:[#allocation2 + $0x18] sm:$0x3] %v1586_v31 }
 0xa26   : > { %v2228_v32 = vpop.eup %2227 }
 0xa27   : > { %v1295_v52 = vmul.f32 %v2228_v32, %v2224_v19  ;;  %v2174_v19 = vld [vmem:[%s2703_s4 + $0x168] ss:$28 sps:$4 sm:$0xff]   ;;  %v2181_v32 = vld [vmem:[%s2703_s4 + $0xbc] ss:$28 sps:$4 sm:$0xff]  }
 0xa29   : > { %v1296_v36 = vpack.c.bf16 %v1295_v52, %v1294_v33  ;;  %v2186_v33 = vld [vmem:[%s2703_s4 + $0x88] ss:$28 sps:$4 sm:$0xff]   ;;  %v1585_v52 = vld [vmem:[%s239_s16 + $0x10] sm:$0xff] }
 0xa2a   : > { %1589 = vst [vmem:[#allocation2 + $0x10] sm:$0xff] %v1585_v52 }
 0xa2b   : > { %2072 = vmatmul.mubr.msk.bf16.vlgmr.msra.gmra.mxu1 %vm913_vm3, %v1296_v36  ;;  %v2189_v36 = vld [vmem:[%s2703_s4 + $0x50] ss:$28 sps:$4 sm:$0xff]  }
 0xa2c   : > { %2084 = vmatpush3.bf16.xpose.msra.mxu1 %v1411_v37  ;;  %2085 = vmatprep.mubr.msk.bf16.mxu1 %vm2246_vm0, %v2245_v1  ;;  %v2187_v37 = vld [vmem:[%s2703_s4 + $0x4c] ss:$28 sps:$4 sm:$0xff]  }
 0xa2d   : > { %2095 = vmatprep.subr.bf16.mxu1 %v2245_v1 }
 0xa33   : > { %2086 = vmatmul.mubr.msk.bf16.vlgmr.msra.gmra.mxu1 %vm865_vm2, %v1404_v38  ;;  %v2192_v38 = vld [vmem:[%s2703_s4 + $0x18] ss:$28 sps:$4 sm:$0xff]  }
 0xa34   : > { %2099 = vmatprep.mubr.msk.bf16.mxu1 %vm2246_vm0, %v2245_v1 }
 0xaeb   : > { %v1337_v41 = vpop.f32.mrf.mxu1 }
 0xaed   : > { %v2073_v42 = vpop.f32.mrf.mxu1 }
 0xaef   : > { %v1340_v43 = vpop.f32.mrf.mxu1 }
 0xaf0   : > { %v1344_v45 = vpack.c.bf16 %v1340_v43, %v1337_v41 }
 0xaf1   : > { %v2074_v46 = vpop.f32.mrf.mxu1 }
 0xaf2   : > { %2080 = vmatmul.mubr.msk.bf16.vlgmr.msra.gmra.mxu0 %vm865_vm2, %v1344_v45 }
 0xaf3   : > { %v1447_v47 = vpop.f32.mrf.mxu1  ;;  %2091 = vmatprep.mubr.msk.bf16.mxu0 %vm2246_vm0, %v2245_v1 }
 0xaf4   : > { %v1454_v48 = vsel %vm913_vm3, %v1447_v47, -inf }
 0xaf5   : > { %1455 = vmax.xlane.f32.xlu1 %v1454_v48  ;;  %v2087_v49 = vpop.f32.mrf.mxu1 }
 0xaf7   : > { %v1450_v50 = vpop.f32.mrf.mxu1 }
 0xaf8   : > { %v1457_v51 = vsel %vm913_vm3, %v1450_v50, -inf }
 0xaf9   : > { %1458 = vmax.xlane.f32.xlu0 %v1457_v51  ;;  %v2088_v53 = vpop.f32.mrf.mxu1  ;;  %v1596_v51 = vld [vmem:[#allocation2 + $0x18] sm:$0x3] }
 0xb7e   : > { %v1456_v54 = vpop.xlane.xlu1 %1455 }
 0xb7f   : > { %v1460_v55 = vsub.f32 %v1447_v47, %v1456_v54 }
 0xb81   : > { %v1462_v56 = vmul.f32 1.442695, %v1460_v55 }
 0xb82   : > { %v1459_v57 = vpop.xlane.xlu0 %1458 }
 0xb83   : > { %2229 = vpow2.f32 %v1462_v56  ;;  %v1461_v58 = vsub.f32 %v1450_v50, %v1459_v57 }
 0xb85   : > { %v1464_v59 = vmul.f32 1.442695, %v1461_v58 }
 0xb87   : > { %2231 = vpow2.f32 %v1464_v59 }
 0xb90   : > { %v2230_v60 = vpop.eup %2229 }
 0xb91   : > { %v1466_v61 = vsel %vm913_vm3, %v2230_v60, 0.0 }
 0xb92   : > { %1467 = vadd.xlane.f32.xlu0 %v1466_v61 }
 0xb94   : > { %v2232_v62 = vpop.eup %2231 }
 0xb95   : > { %v1469_v63 = vsel %vm913_vm3, %v2232_v62, 0.0 }
 0xb96   : > { %1470 = vadd.xlane.f32.xlu1 %v1469_v63 }
 0xba8   : > { %1477 = vrot.lane.b32.xlu0 %v2388_v12, %s2250_s10  ;;  %v2167_v12 = vld [vmem:[%s2703_s4 + $0x198] ss:$28 sps:$4 sm:$0xff]  }
 0xba9   : > { %2096 = vmatpush3.bf16.msra.mxu1 %v2167_v12 }
 0xbaa   : > { %2097 = vmatprep.subr.bf16.mxu1 %v2245_v1  ;;  %v2172_v1 = vld [vmem:[%s2703_s4 + $0x164] ss:$28 sps:$4 sm:$0xff]  }
 0xbad   : > { %2098 = vmatpush3.bf16.msra.mxu1 %v2168_v16 }
 0xbb2   : > { %v1394_v0 = vpop.f32.mrf.mxu0 }
 0xbb3   : > { %v2623_v2 = vadd.f32 %v1394_v0, %v1221_v23 }
 0xbb4   : > { %v2081_v3 = vpop.f32.mrf.mxu0 }
 0xbb6   : > { %v1397_v4 = vpop.f32.mrf.mxu0 }
 0xbb7   : > { %v2625_v5 = vadd.f32 %v1397_v4, %v1222_v27 }
 0xbb8   : > { %v2082_v6 = vpop.f32.mrf.mxu0 }
 0xc1b   : > { %v1468_v7 = vpop.xlane.xlu0 %1467 }
 0xc1c   : > { %2233 = vrcp.f32 %v1468_v7 }
 0xc1f   : > { %v1471_v8 = vpop.xlane.xlu1 %1470  ;;  %v1478_v9 = vpop.permute.xlu0 %1477 }
 0xc20   : > { %2235 = vrcp.f32 %v1471_v8  ;;  %2090 = vmatpush3.bf16.msra.mxu0 %v1478_v9 }
 0xc21   : > { %1695 = vmatprep.subr.bf16.mxu0 %v2171_v18 }
 0xc29   : > { %v2234_v10 = vpop.eup %2233 }
 0xc2a   : > { %v1474_v14 = vmul.f32 %v2234_v10, %v2230_v60 }
 0xc2d   : > { %v2236_v11 = vpop.eup %2235 }
 0xc2e   : > { %v1475_v13 = vmul.f32 %v2236_v11, %v2232_v62 }
 0xc30   : > { %v1476_v15 = vpack.c.bf16 %v1475_v13, %v1474_v14 }
 0xc32   : > { %2092 = vmatmul.mubr.msk.bf16.vlgmr.msra.gmra.mxu0 %vm913_vm3, %v1476_v15 }
 0xc33   : > { %1727 = vmatprep.mubr.bf16.mxu0 %v2247_v35  ;;  %1696 = vmatpush1.bf16.msra.mxu0 %v2169_v17 }
 0xc34   : > { %1697 = vmatprep.subr.bf16.mxu0 %v2174_v19 }
 0xc37   : > { %1698 = vmatpush1.bf16.msra.mxu0 %v2172_v1 }
 0xc38   : > { %1699 = vmatprep.subr.bf16.mxu0 %v2177_v20 }
 0xc3b   : > { %1700 = vmatpush1.bf16.msra.mxu0 %v2175_v44 }
 0xc3c   : > { %1701 = vmatprep.subr.bf16.mxu0 %v2180_v21 }
 0xc3f   : > { %1702 = vmatpush1.bf16.msra.mxu0 %v2178_v22 }
 0xc40   : > { %1703 = vmatprep.subr.bf16.mxu0 %v2183_v28 }
 0xc43   : > { %1704 = vmatpush1.bf16.msra.mxu0 %v2181_v32 }
 0xc44   : > { %1705 = vmatprep.subr.bf16.mxu0 %v2186_v33 }
 0xc47   : > { %1706 = vmatpush1.bf16.msra.mxu0 %v2184_v34 }
 0xc48   : > { %1707 = vmatprep.subr.bf16.mxu0 %v2189_v36 }
 0xc4b   : > { %1708 = vmatpush1.bf16.msra.mxu0 %v2187_v37 }
 0xc4c   : > { %1709 = vmatprep.subr.bf16.mxu0 %v2192_v38 }
 0xc4f   : > { %1710 = vmatpush1.bf16.msra.mxu0 %v2190_v39 }
 0xcf2   : > { %v1517_v23 = vpop.f32.mrf.mxu0 }
 0xcf4   : > { %v2093_v24 = vpop.f32.mrf.mxu0 }
 0xcf6   : > { %v1520_v25 = vpop.f32.mrf.mxu0 }
 0xcf7   : > { %v1524_v26 = vpack.c.bf16 %v1520_v25, %v1517_v23 }
 0xcf8   : > { %v2094_v27 = vpop.f32.mrf.mxu0 }
 0xcf9   : > { %2100 = vmatmul.mubr.msk.bf16.vlgmr.msra.gmra.mxu1 %vm865_vm2, %v1524_v26 }
 0xdb9   : > { %v1574_v40 = vpop.f32.mrf.mxu1 }
 0xdba   : > { %v1581_v41 = vadd.f32 %v1574_v40, %v2623_v2 }
 0xdbb   : > { %v2101_v42 = vpop.f32.mrf.mxu1 }
 0xdbc   : > { %1591 = vst [vmem:[#allocation2 + $0x1] sm:$0xff] %v1581_v41 }
 0xdbd   : > { %v1577_v43 = vpop.f32.mrf.mxu1 }
 0xdbe   : > { %v1582_v45 = vadd.f32 %v1577_v43, %v2625_v5 }
 0xdbf   : > { %v2102_v46 = vpop.f32.mrf.mxu1 }
 0xdc0   : > { %1592 = vst [vmem:[#allocation2 + $0x9] sm:$0xff] %v1582_v45 }
 0xdc3   : > { %v1593_v47 = vld [vmem:[#allocation2] sm:$0xff] }
 0xdc7   : > { %v1594_v48 = vld [vmem:[#allocation2 + $0x8] sm:$0xff]  ;;  %v1595_v50 = vld [vmem:[#allocation2 + $0x10] sm:$0xff] }
 0xdc8   : > { %v1597_v49 = vpack.c.bf16 %v1594_v48, %v1593_v47  ;;  %v1598_v53 = vpack.c.bf16 %v1596_v51, %v1595_v50 }
 0xdca   : > { %1728 = vmatmul.mubr.bf16.vlgmr.msra.gmra.mxu0 %v1597_v49 }
 0xdcb   : > { %1737 = vmatprep.mubr.bf16.mxu0 %v2247_v35 }
 0xdd2   : > { %1738 = vmatmul.mubr.bf16.gmra.mxu0 %v1598_v53 }
 0xe8a   : > { %v1729_v54 = vpop.f32.mrf.mxu0 }
 0xe8b   : > { %1748 = vst [vmem:[%s244_s13] sm:$0xff] %v1729_v54 }
 0xe8c   : > { %v1731_v55 = vpop.f32.mrf.mxu0 }
 0xe8d   : > { %1749 = vst [vmem:[%s244_s13 + $0x8] sm:$0xff] %v1731_v55 }
 0xe8e   : > { %v1733_v56 = vpop.f32.mrf.mxu0 }
 0xe8f   : > { %1750 = vst [vmem:[%s244_s13 + $0x10] sm:$0xff] %v1733_v56 }
 0xe90   : > { %v1735_v57 = vpop.f32.mrf.mxu0 }
 0xe91   : > { %1751 = vst [vmem:[%s244_s13 + $0x18] sm:$0xff] %v1735_v57 }
 0xe92   : > { %v1739_v58 = vpop.f32.mrf.mxu0 }
 0xe93   : > { %1752 = vst [vmem:[%s244_s13 + $0x20] sm:$0xff] %v1739_v58 }
 0xe94   : > { %v1741_v35 = vpop.f32.mrf.mxu0 }
 0xe95   : > { %1753 = vst [vmem:[%s244_s13 + $0x28] sm:$0xff] %v1741_v35 }
 0xe96   : > { %v1743_v59 = vpop.f32.mrf.mxu0 }
 0xe97   : > { %1754 = vst [vmem:[%s244_s13 + $0x30] sm:$0x3] %v1743_v59 }
 0xe98   : > { %v1745_v60 = vpop.f32.mrf.mxu0 }
 0xe99   : > { %1755 = vst [vmem:[%s244_s13 + $0x38] sm:$0x3] %v1745_v60 }
 0xe9a PF: > { %s15_s18 = sadd.s32 1, %s2243_s18  }
 0xe9b   : > { %p12_p4 = scmp.ge.s32.totalorder %s15_s18, 4  }
 0xe9d   :  { %14 = sbr.rel (!%p12_p4) target bundleno = 1 (0x1), region = 73 }

</bundles_post_ra>
